<compile_context>
chip_gen: v7x
topology: tpu7x:2x2x1
jax: 0.10.0
libtpu: 0.0.40
codegen_flags: <defaults>
</compile_context>

<pallas_src>
import functools

import jax
import jax.numpy as jnp
from jax import lax
from jax.experimental import pallas as pl
from jax.experimental.pallas import tpu as pltpu


def get_loss_kernel(pred_ref, target_ref, mulv_ref, pred_f_ref, true_t_ref,
                    out_ref, *, hw, lambda_sim, lambda_kld):
    f32 = jnp.float32

    # ---------------- F.nll_loss(pred, target), reduction='mean' -----------
    # Single iota-compare + select + reduce (vectorized gather).
    pred = pred_ref[...].astype(f32)                     # (B, NC) log-probs
    B, NC = pred.shape
    tgt = target_ref[...]                                # (B, 1) int32
    lane = lax.broadcasted_iota(jnp.int32, (B, NC), 1)
    picked = jnp.sum(jnp.where(lane == tgt, pred, f32(0.0)))
    nll = -picked / f32(B)

    # ---------------- FeatureSimilarityLoss (lambda = 0.1) -----------------
    # Reference semantics (3-D .T broadcast), with P/T = feats.reshape(b,c,hw):
    #   sim[n, i, j] = sum_k P[n, k, i] * T[j, n, k] / hw
    # Wrapper passes Tt[n, j, k] = T[j, n, k] (shape (c, b, hw)), so this is a
    # vanilla leading-batch matmul on the MXU:
    #   simT[n, j, i] = sum_k Tt[n, j, k] * P[n, k, i]  (= hw * sim[n, i, j])
    P = pred_f_ref[...].astype(f32)                      # (b, c, hw)
    Tt = true_t_ref[...].astype(f32)                     # (c, b, hw)
    simT = lax.dot_general(
        Tt, P,
        dimension_numbers=(((2,), (1,)), ((0,), (0,))),
        preferred_element_type=jnp.float32) * f32(1.0 / hw)   # (b, b, hw) = (n, j, i)

    # lse1[n, i] = logsumexp_j sim[n, i, j]  -> reduce over axis 1 of simT
    m1 = jnp.max(simT, axis=1)                           # (b, hw)
    lse1 = jnp.log(jnp.sum(jnp.exp(simT - m1[:, None, :]), axis=1)) + m1

    # lse2[n, m] = logsumexp over the spatial axis of P (b, c, hw)
    m2 = jnp.max(P, axis=-1)                             # (b, c)
    lse2 = jnp.log(jnp.sum(jnp.exp(P - m2[..., None]), axis=-1)) + m2

    # reference adds them elementwise (relies on hw == c, b == c)
    feat_loss = lambda_sim * jnp.mean(lse2 - lse1)

    # ---------------- KLDivLoss (lambda = 0.1) ------------------------------
    mu = mulv_ref[0].astype(f32)                         # (B, latent)
    lv = mulv_ref[1].astype(f32)
    kld = -0.5 * jnp.sum(1.0 + lv - mu * mu - jnp.exp(lv))
    kld_loss = lambda_kld * kld / f32(mu.shape[0] * mu.shape[1])

    out_ref[0, 0] = nll + feat_loss + kld_loss


def get_loss(pred, target, mu, logvar, pred_feats, true_feats,
             lambda_sim=0.1, lambda_kld=0.1):
    b, c, h, w = pred_feats.shape
    hw = h * w
    # Required for the reference torch code to be well-defined (3-D .T matmul)
    assert c == hw and b == c, "reference semantics require C == H*W and B == C"

    pred = pred.astype(jnp.float32)
    target_col = target.astype(jnp.int32).reshape(-1, 1)                # (B, 1)
    # one DMA instead of two for the latent stats
    mulv = jnp.stack([mu.astype(jnp.float32), logvar.astype(jnp.float32)])  # (2,B,latent)
    # free reshape (contiguous)
    pred_f = pred_feats.reshape(b, c, hw)                               # (b, c, hw)
    # tiny (16 KiB) layout plumbing so the in-kernel contraction is a plain
    # leading-batch matmul (no in-kernel transposes needed)
    true_t = true_feats.reshape(b, c, hw).transpose(1, 0, 2)            # (c, b, hw)

    kernel = functools.partial(get_loss_kernel, hw=hw,
                               lambda_sim=lambda_sim, lambda_kld=lambda_kld)

    # Advisory cost estimate (kernel is tiny / overhead-bound).
    flops = 2 * b * b * c * hw + 8 * b * c * hw + 6 * mulv.size + 3 * pred.size
    transcendentals = b * b * hw + b * c * hw + mu.size
    bytes_accessed = int(
        pred.size * 4 + target_col.size * 4 + mulv.size * 4
        + pred_f.size * 4 + true_t.size * 4 + 4)

    vmem = pl.BlockSpec(memory_space=pltpu.MemorySpace.VMEM)
    smem = pl.BlockSpec(memory_space=pltpu.MemorySpace.SMEM)

    out = pl.pallas_call(
        kernel,
        out_shape=jax.ShapeDtypeStruct((1, 1), jnp.float32),
        in_specs=[vmem, vmem, vmem, vmem, vmem],
        out_specs=smem,
        cost_estimate=pl.CostEstimate(flops=flops,
                                      transcendentals=transcendentals,
                                      bytes_accessed=bytes_accessed),
    )(pred, target_col, mulv, pred_f, true_t)
    return out[0, 0]


def _reference_loss(pred, target, mu, logvar, pred_feats, true_feats,
                    lambda_sim=0.1, lambda_kld=0.1):
    # pure-JAX reference mirroring the PyTorch module
    b, c, h, w = pred_feats.shape
    nll = -jnp.mean(pred[jnp.arange(pred.shape[0]), target])
    pr = pred_feats.reshape(b, c, h * w).transpose(0, 2, 1)
    tr = true_feats.reshape(b, c, h * w).transpose(0, 2, 1)
    sim = jnp.matmul(pr, jnp.transpose(tr, (2, 1, 0)),
                     precision=jax.lax.Precision.HIGHEST) / (h * w)
    lse1 = jax.scipy.special.logsumexp(sim, axis=-1)
    lse2 = jax.scipy.special.logsumexp(pr.transpose(0, 2, 1), axis=-1)
    feat = lambda_sim * jnp.mean(-lse1 + lse2)
    kld = lambda_kld * (-0.5 * jnp.sum(1.0 + logvar - mu ** 2 - jnp.exp(logvar))
                        / mu.size)
    return nll + feat + kld


if __name__ == "__main__":
    key = jax.random.PRNGKey(0)
    k1, k2, k3, k4, k5, k6 = jax.random.split(key, 6)

    B, NC = 16, 8                   # classifier batch / num classes
    b, c, h, w = 16, 16, 4, 4       # feature maps: b == c == h*w
    latent = 32

    logits = jax.random.normal(k1, (B, NC), jnp.float32)
    pred = jax.nn.log_softmax(logits, axis=-1)          # log-probs as in NLL
    target = jax.random.randint(k2, (B,), 0, NC, dtype=jnp.int32)
    mu = jax.random.normal(k3, (B, latent), jnp.float32)
    logvar = 0.1 * jax.random.normal(k4, (B, latent), jnp.float32)
    pred_feats = jax.random.normal(k5, (b, c, h, w), jnp.float32)
    true_feats = jax.random.normal(k6, (b, c, h, w), jnp.float32)

    loss = get_loss(pred, target, mu, logvar, pred_feats, true_feats)
    loss = jax.block_until_ready(loss)

    ref = _reference_loss(pred, target, mu, logvar, pred_feats, true_feats)
    assert jnp.allclose(loss, ref, rtol=1e-3, atol=1e-4), (loss, ref)
    print("KERNEL_OK")
</pallas_src>

<mosaic_0001>
module attributes {stable_mosaic.version = 11 : i64} {
  func.func @get_loss_kernel(%arg0: memref<16x8xf32, #tpu.memory_space<vmem>>, %arg1: memref<16x1xi32, #tpu.memory_space<vmem>>, %arg2: memref<2x16x32xf32, #tpu.memory_space<vmem>>, %arg3: memref<16x16x16xf32, #tpu.memory_space<vmem>>, %arg4: memref<16x16x16xf32, #tpu.memory_space<vmem>>, %arg5: memref<1x1xf32, #tpu.memory_space<smem>>) attributes {dimension_semantics = [], scalar_prefetch = 0 : i64, scratch_operands = 0 : i64, tpu.core_type = #tpu.core_type<tc>} {
    %c0 = arith.constant 0 : index
    %c0_0 = arith.constant 0 : index
    %0 = vector.load %arg0[%c0, %c0_0] : memref<16x8xf32, #tpu.memory_space<vmem>>, vector<16x8xf32>
    %c0_1 = arith.constant 0 : index
    %c0_2 = arith.constant 0 : index
    %1 = vector.load %arg1[%c0_1, %c0_2] : memref<16x1xi32, #tpu.memory_space<vmem>>, vector<16x1xi32>
    %2 = tpu.iota {dimensions = array<i32: 1>} : vector<16x8xi32>
    %3 = vector.broadcast %1 : vector<16x1xi32> to vector<16x8xi32>
    %4 = arith.cmpi eq, %2, %3 : vector<16x8xi32>
    %cst = arith.constant 0.000000e+00 : f32
    %5 = vector.broadcast %cst : f32 to vector<16x8xf32>
    %6 = arith.select %4, %0, %5 : vector<16x8xi1>, vector<16x8xf32>
    %7 = vector.shape_cast %6 : vector<16x8xf32> to vector<1x16x8xf32>
    %cst_3 = arith.constant dense<0.000000e+00> : vector<1xf32>
    %8 = vector.multi_reduction <add>, %7, %cst_3 [1, 2] : vector<1x16x8xf32> to vector<1xf32>
    %9 = vector.shape_cast %8 : vector<1xf32> to vector<1x1x1xf32>
    %10 = vector.extract %9[0, 0, 0] : f32 from vector<1x1x1xf32>
    %cst_4 = arith.constant 0.000000e+00 : f32
    %11 = arith.subf %cst_4, %10 : f32
    %cst_5 = arith.constant 1.600000e+01 : f32
    %12 = arith.divf %11, %cst_5 : f32
    %c0_6 = arith.constant 0 : index
    %c0_7 = arith.constant 0 : index
    %c0_8 = arith.constant 0 : index
    %13 = vector.load %arg3[%c0_6, %c0_7, %c0_8] : memref<16x16x16xf32, #tpu.memory_space<vmem>>, vector<16x16x16xf32>
    %c0_9 = arith.constant 0 : index
    %c0_10 = arith.constant 0 : index
    %c0_11 = arith.constant 0 : index
    %14 = vector.load %arg4[%c0_9, %c0_10, %c0_11] : memref<16x16x16xf32, #tpu.memory_space<vmem>>, vector<16x16x16xf32>
    %cst_12 = arith.constant dense<0.000000e+00> : vector<16x16x16xf32>
    %15 = tpu.matmul %14, %13, %cst_12 {dimension_numbers = #tpu.dot_dimension_numbers<[2], [1], [1], [2], [0, 0, 0, 1, 1, 2], [0], [0]>} : vector<16x16x16xf32>, vector<16x16x16xf32>, vector<16x16x16xf32> -> vector<16x16x16xf32>
    %cst_13 = arith.constant 6.250000e-02 : f32
    %16 = vector.broadcast %cst_13 : f32 to vector<16x16x16xf32>
    %17 = arith.mulf %15, %16 : vector<16x16x16xf32>
    %cst_14 = arith.constant dense<0xFF800000> : vector<16x16xf32>
    %18 = vector.multi_reduction <maximumf>, %17, %cst_14 [1] : vector<16x16x16xf32> to vector<16x16xf32>
    %19 = vector.shape_cast %18 : vector<16x16xf32> to vector<16x1x16xf32>
    %20 = vector.broadcast %19 : vector<16x1x16xf32> to vector<16x16x16xf32>
    %21 = arith.subf %17, %20 : vector<16x16x16xf32>
    %22 = math.exp %21 : vector<16x16x16xf32>
    %cst_15 = arith.constant dense<0.000000e+00> : vector<16x16xf32>
    %23 = vector.multi_reduction <add>, %22, %cst_15 [1] : vector<16x16x16xf32> to vector<16x16xf32>
    %24 = math.log %23 : vector<16x16xf32>
    %25 = arith.addf %24, %18 : vector<16x16xf32>
    %cst_16 = arith.constant dense<0xFF800000> : vector<16x16xf32>
    %26 = vector.multi_reduction <maximumf>, %13, %cst_16 [2] : vector<16x16x16xf32> to vector<16x16xf32>
    %27 = vector.shape_cast %26 : vector<16x16xf32> to vector<16x16x1xf32>
    %28 = vector.broadcast %27 : vector<16x16x1xf32> to vector<16x16x16xf32>
    %29 = arith.subf %13, %28 : vector<16x16x16xf32>
    %30 = math.exp %29 : vector<16x16x16xf32>
    %cst_17 = arith.constant dense<0.000000e+00> : vector<16x16xf32>
    %31 = vector.multi_reduction <add>, %30, %cst_17 [2] : vector<16x16x16xf32> to vector<16x16xf32>
    %32 = math.log %31 : vector<16x16xf32>
    %33 = arith.addf %32, %26 : vector<16x16xf32>
    %34 = arith.subf %33, %25 : vector<16x16xf32>
    %35 = vector.shape_cast %34 : vector<16x16xf32> to vector<1x16x16xf32>
    %cst_18 = arith.constant dense<0.000000e+00> : vector<1xf32>
    %36 = vector.multi_reduction <add>, %35, %cst_18 [1, 2] : vector<1x16x16xf32> to vector<1xf32>
    %37 = vector.shape_cast %36 : vector<1xf32> to vector<1x1x1xf32>
    %38 = vector.extract %37[0, 0, 0] : f32 from vector<1x1x1xf32>
    %cst_19 = arith.constant 2.560000e+02 : f32
    %39 = arith.divf %38, %cst_19 : f32
    %cst_20 = arith.constant 1.000000e-01 : f32
    %40 = arith.mulf %cst_20, %39 : f32
    %c0_21 = arith.constant 0 : index
    %c0_22 = arith.constant 0 : index
    %c0_23 = arith.constant 0 : index
    %41 = vector.load %arg2[%c0_21, %c0_22, %c0_23] : memref<2x16x32xf32, #tpu.memory_space<vmem>>, vector<1x16x32xf32>
    %42 = vector.shape_cast %41 : vector<1x16x32xf32> to vector<16x32xf32>
    %c1 = arith.constant 1 : index
    %c0_24 = arith.constant 0 : index
    %c0_25 = arith.constant 0 : index
    %43 = vector.load %arg2[%c1, %c0_24, %c0_25] : memref<2x16x32xf32, #tpu.memory_space<vmem>>, vector<1x16x32xf32>
    %44 = vector.shape_cast %43 : vector<1x16x32xf32> to vector<16x32xf32>
    %cst_26 = arith.constant 1.000000e+00 : f32
    %45 = vector.broadcast %cst_26 : f32 to vector<16x32xf32>
    %46 = arith.addf %45, %44 : vector<16x32xf32>
    %47 = arith.mulf %42, %42 : vector<16x32xf32>
    %48 = arith.subf %46, %47 : vector<16x32xf32>
    %49 = math.exp %44 : vector<16x32xf32>
    %50 = arith.subf %48, %49 : vector<16x32xf32>
    %51 = vector.shape_cast %50 : vector<16x32xf32> to vector<1x16x32xf32>
    %cst_27 = arith.constant dense<0.000000e+00> : vector<1xf32>
    %52 = vector.multi_reduction <add>, %51, %cst_27 [1, 2] : vector<1x16x32xf32> to vector<1xf32>
    %53 = vector.shape_cast %52 : vector<1xf32> to vector<1x1x1xf32>
    %54 = vector.extract %53[0, 0, 0] : f32 from vector<1x1x1xf32>
    %cst_28 = arith.constant -5.000000e-01 : f32
    %55 = arith.mulf %cst_28, %54 : f32
    %cst_29 = arith.constant 1.000000e-01 : f32
    %56 = arith.mulf %cst_29, %55 : f32
    %cst_30 = arith.constant 5.120000e+02 : f32
    %57 = arith.divf %56, %cst_30 : f32
    %58 = arith.addf %12, %40 : f32
    %59 = arith.addf %58, %57 : f32
    %c0_31 = arith.constant 0 : index
    %c0_32 = arith.constant 0 : index
    %60 = memref.load %arg5[%c0_31, %c0_32] : memref<1x1xf32, #tpu.memory_space<smem>>
    memref.store %59, %arg5[%c0_31, %c0_32] : memref<1x1xf32, #tpu.memory_space<smem>>
    return
  }
}

</mosaic_0001>

<bundles_post_ra>
// kernel: tpu_custom_call.1
= control target key start
LH: loop header
LB: loop body
LE: loop exit
PB: predicated region body
PF: predicated region fallthrough
CT: control target
= control target key end

     0   :  { %10 = vsyncpa [#allocation3], 0  ;;  %s4461_s0 = inlined_call_operand.vmem [shape: f32[16,8], index: 0, kind: input, shape index: {}]   ;;  %s4462_s1 = inlined_call_operand.vmem [shape: s32[16,1], index: 1, kind: input, shape index: {}]   ;;  %s4463_s2 = inlined_call_operand.vmem [shape: f32[2,16,32], index: 2, kind: input, shape index: {}]   ;;  %s4464_s3 = inlined_call_operand.hbm [shape: f32[16,16,16], index: 3, kind: input, shape index: {}]   ;;  %s4465_s4 = inlined_call_operand.hbm [shape: f32[16,16,16], index: 4, kind: input, shape index: {}]   ;;  %s4466_s5 = inlined_call_operand.hbm [shape: f32[1,1], index: 5, kind: output, shape index: {}]  }
   0x1   :  { %11 = vsyncpa [#allocation6], 0 }
   0x2   :  { %12 = vsyncpa [#allocation4], 0  ;;  %s3426_s18 = smov [#allocation2]   ;;  %s3366_s22 = scalar_lea.hbm %s4464_s3, 4096 }
   0x3   :  { %s24_s19 = sshll.u32 %s3426_s18, 4  ;;  %p3367_p0 = scmp.ne.s32.totalorder %s4464_s3, %s3366_s22  ;;  %s25_s19 = int_to_ptr.vmem [resolvable:$true] %s24_s19 }
   0x4   :  { %p3370_p1 = scmp.lt.u32.totalorder %s3366_s22, %s4464_s3 }
   0x6   :  { %p3372_p2 = pnand %p3370_p1, %p3367_p0 }
   0x8   :  { %3375 = shalt.err (!%p3372_p2)
}
   0x9   :  { %s3376_s27 = scalar_lea.vmem %s25_s19, 4096  ;;  %p3381_p4 = scmp.lt.s32.totalorder %s25_s19, %s25_s19 }
   0xa   :  { %p3377_p3 = scmp.ne.s32.totalorder %s25_s19, %s3376_s27  ;;  %p3382_p5 = scmp.lt.s32.totalorder %s3376_s27, %s3376_s27 }
   0xc   :  { %p3383_p6 = por %p3382_p5, %p3381_p4 }
   0xe   :  { %p3384_p7 = pnand %p3383_p6, %p3377_p3 }
  0x10   :  { %3387 = shalt.err (!%p3384_p7)
}
  0x11   :  { %s3427_s28 = smov 128   ;;  %s3428_s29 = smov 8  }
  0x12   :  { %30 = dma.hbm_to_vmem [thread:$0]  %s4464_s3, 4096, %s25_s19, [#allocation3], %s3427_s28, %s3427_s28, %s3428_s29  }
  0x13   :  { %s3429_s7 = smov [#allocation5]   ;;  %s3388_s11 = scalar_lea.hbm %s4465_s4, 4096 }
  0x14   :  { %s36_s8 = sshll.u32 %s3429_s7, 4  ;;  %p3389_p8 = scmp.ne.s32.totalorder %s4465_s4, %s3388_s11  ;;  %s37_s8 = int_to_ptr.vmem [resolvable:$true] %s36_s8 }
  0x15   :  { %p3392_p9 = scmp.lt.u32.totalorder %s3388_s11, %s4465_s4 }
  0x17   :  { %p3394_p10 = pnand %p3392_p9, %p3389_p8 }
  0x19   :  { %3397 = shalt.err (!%p3394_p10)
}
  0x1a   :  { %s3398_s16 = scalar_lea.vmem %s37_s8, 4096  ;;  %p3403_p12 = scmp.lt.s32.totalorder %s37_s8, %s37_s8 }
  0x1b   :  { %p3399_p11 = scmp.ne.s32.totalorder %s37_s8, %s3398_s16  ;;  %p3404_p13 = scmp.lt.s32.totalorder %s3398_s16, %s3398_s16 }
  0x1d   :  { %p3405_p0 = por %p3404_p13, %p3403_p12 }
  0x1f   :  { %p3406_p1 = pnand %p3405_p0, %p3399_p11 }
  0x21   :  { %3409 = shalt.err (!%p3406_p1)
}
  0x22   :  { %42 = dma.hbm_to_vmem [thread:$0]  %s4465_s4, 4096, %s37_s8, [#allocation6], %s3427_s28, %s3427_s28, %s3428_s29  }
  0x23   :  { %3420 = dma.done.wait [#allocation3], 4096  }
  0x24   :  { %3421 = vsyncadd [#allocation3], 4294963200 }
  0x25   :  { %3422 = dma.done.wait [#allocation6], 4096  }
  0x26   :  { %3423 = vsyncadd [#allocation6], 4294963200  ;;  %vm146_vm0 = vcmask 130048   ;;  %v3486_v0 = vld [vmem:[#allocation2] sm:$0xff]  ;;  %v3488_v1 = vld [vmem:[#allocation2 + $0x8] sm:$0xff]  ;;  %vm2620_vm1 = vcmask 130112  }
  0x27   :  { %v3490_v2 = vld [vmem:[#allocation2 + $0x10] sm:$0xff]  ;;  %v1907_v3 = vsel %vm146_vm0, %v3486_v0, -inf  ;;  %v3060_v4 = vpack.c.bf16 %v3488_v1, %v3486_v0  ;;  %v3496_v5 = vld [vmem:[#allocation2 + $0x18] sm:$0xff]  ;;  %v114_v6 = vld [vmem:[#allocation5] sm:$0xff]  ;;  %v1910_v11 = vsel %vm146_vm0, %v3488_v1, -inf  ;;  %vm2757_vm2 = vcmask 1041409  }
  0x28   :  { %v116_v7 = vld [vmem:[#allocation5 + $0x10] sm:$0xff]  ;;  %1908 = vmax.xlane.f32.xlu0 %v1907_v3  ;;  %v3064_v8 = vpack.c.bf16 %v3496_v5, %v3490_v2  ;;  %2952 = vmatprep.mubr.msk.f32.mxu0 %vm146_vm0, %v114_v6  ;;  %v1913_v9 = vsel %vm146_vm0, %v3490_v2, -inf  ;;  %v3503_v10 = vld [vmem:[#allocation2 + $0x20] sm:$0xff]  ;;  %v3508_v12 = vld [vmem:[#allocation2 + $0x28] sm:$0xff]  ;;  %v1916_v21 = vsel %vm146_vm0, %v3496_v5, -inf  ;;  %vm2759_vm3 = vcmask 1042434  }
  0x29   :  { %3061 = vmatprep.subr.bf16.mxu0 %v3060_v4  ;;  %2959 = vmatprep.mubr.msk.f32.mxu1 %vm146_vm0, %v116_v7  ;;  %v3510_v13 = vld [vmem:[#allocation2 + $0x30] sm:$0xff]  ;;  %v3512_v14 = vld [vmem:[#allocation2 + $0x38] sm:$0xff]  ;;  %v115_v15 = vld [vmem:[#allocation5 + $0x8] sm:$0xff]  ;;  %v3068_v16 = vpack.c.bf16 %v3508_v12, %v3503_v10  ;;  %v1919_v49 = vsel %vm146_vm0, %v3503_v10, -inf  ;;  %v1922_v57 = vsel %vm146_vm0, %v3508_v12, -inf  ;;  %vm2761_vm4 = vcmask 1043459  }
  0x2a   :  { %3065 = vmatprep.subr.bf16.mxu1 %v3064_v8  ;;  %3063 = vmatpush3.bf16.msra.mxu0 %v3060_v4  ;;  %v3072_v17 = vpack.c.bf16 %v3512_v14, %v3510_v13  ;;  %v3518_v18 = vld [vmem:[#allocation2 + $0x80] sm:$0xff]  ;;  %v117_v19 = vld [vmem:[#allocation5 + $0x18] sm:$0xff]  ;;  %v3524_v22 = vld [vmem:[#allocation2 + $0x48] sm:$0xff]  ;;  %vm2763_vm5 = vcmask 1044484   ;;  %vm2765_vm6 = vcmask 1045509   ;;  %vm2767_vm7 = vcmask 1046534  }
  0x2b   :  { %3067 = vmatpush3.bf16.msra.mxu1 %v3064_v8  ;;  %1914 = vmax.xlane.f32.xlu1 %v1913_v9  ;;  %v3520_v20 = vld [vmem:[#allocation2 + $0x40] sm:$0xff]  ;;  %v3526_v23 = vld [vmem:[#allocation2 + $0x50] sm:$0xff]  ;;  %v3528_v24 = vld [vmem:[#allocation2 + $0x58] sm:$0xff]  ;;  %v1955_v26 = vsel %vm146_vm0, %v3518_v18, -inf  ;;  %vm2769_vm8 = vcmask 1047559   ;;  %vm2813_vm9 = vcmask 261120  }
  0x2c   :  { %1911 = vmax.xlane.f32.xlu0 %v1910_v11  ;;  %3069 = vmatprep.subr.bf16.mxu0 %v3068_v16  ;;  %v120_v25 = vld [vmem:[#allocation5 + $0x30] sm:$0xff]  ;;  %v118_v27 = vld [vmem:[#allocation5 + $0x20] sm:$0xff]  ;;  %v3076_v28 = vpack.c.bf16 %v3524_v22, %v3520_v20  ;;  %v119_v29 = vld [vmem:[#allocation5 + $0x28] sm:$0xff]  ;;  %v3080_v32 = vpack.c.bf16 %v3528_v24, %v3526_v23  ;;  %vm65_vm11 = vcmask 64512   ;;  %s3410_s4 = scalar_lea.hbm %s4466_s5, 16 }
  0x2d   :  { %2953 = vmatmul.mubr.msk.f32.vlgmr.msra.gmra.mrb[0].mxu0 %vm146_vm0, %v115_v15  ;;  %3073 = vmatprep.subr.bf16.mxu1 %v3072_v17  ;;  %v121_v30 = vld [vmem:[#allocation5 + $0x38] sm:$0xff]  ;;  %v3536_v31 = vld [vmem:[#allocation2 + $0x88] sm:$0xff]  ;;  %v3540_v33 = vld [vmem:[#allocation2 + $0x90] sm:$0xff]  ;;  %p3411_p2 = scmp.ne.s32.totalorder %s4466_s5, %s3410_s4  ;;  %p3414_p3 = scmp.lt.u32.totalorder %s3410_s4, %s4466_s5 }
  0x2e   :  { %2960 = vmatmul.mubr.msk.f32.vlgmr.msra.gmra.mrb[0].mxu1 %vm146_vm0, %v117_v19  ;;  %3071 = vmatpush3.bf16.msra.mxu0 %v3068_v16  ;;  %v3542_v34 = vld [vmem:[#allocation2 + $0x60] sm:$0xff]  ;;  %v3544_v35 = vld [vmem:[#allocation2 + $0x68] sm:$0xff]  ;;  %v1958_v36 = vsel %vm146_vm0, %v3536_v31, -inf  ;;  %v3550_v37 = vld [vmem:[#allocation2 + $0x70] sm:$0xff]  ;;  %v1961_v40 = vsel %vm146_vm0, %v3540_v33, -inf  ;;  %v3092_v50 = vpack.c.bf16 %v3536_v31, %v3518_v18 }
  0x2f   :  { %3075 = vmatpush3.bf16.msra.mxu1 %v3072_v17  ;;  %1917 = vmax.xlane.f32.xlu1 %v1916_v21  ;;  %v3552_v38 = vld [vmem:[#allocation2 + $0x78] sm:$0xff]  ;;  %v124_v39 = vld [vmem:[#allocation5 + $0x50] sm:$0xff]  ;;  %v3084_v41 = vpack.c.bf16 %v3544_v35, %v3542_v34  ;;  %v122_v42 = vld [vmem:[#allocation5 + $0x40] sm:$0xff]  ;;  %v1925_v17 = vsel %vm146_vm0, %v3510_v13, -inf  ;;  %p3416_p4 = pnand %p3414_p3, %p3411_p2 }
  0x30   :  { %2973 = vmatprep.mubr.msk.f32.mxu1 %vm146_vm0, %v120_v25  ;;  %1956 = vmax.xlane.f32.xlu0 %v1955_v26  ;;  %v3560_v43 = vld [vmem:[#allocation2 + $0x98] sm:$0xff]  ;;  %v123_v44 = vld [vmem:[#allocation5 + $0x48] sm:$0xff]  ;;  %v3088_v46 = vpack.c.bf16 %v3552_v38, %v3550_v37  ;;  %v128_v48 = vld [vmem:[#allocation5 + $0x70] sm:$0xff] }
  0x31   :  { %2966 = vmatprep.mubr.msk.f32.mxu0 %vm146_vm0, %v118_v27  ;;  %3077 = vmatprep.subr.bf16.mxu0 %v3076_v28  ;;  %v125_v45 = vld [vmem:[#allocation5 + $0x58] sm:$0xff]  ;;  %v1964_v47 = vsel %vm146_vm0, %v3560_v43, -inf  ;;  %v126_v51 = vld [vmem:[#allocation5 + $0x60] sm:$0xff]  ;;  %v127_v52 = vld [vmem:[#allocation5 + $0x68] sm:$0xff]  ;;  %v3096_v54 = vpack.c.bf16 %v3560_v43, %v3540_v33 }
  0x32   :  { %2967 = vmatmul.mubr.msk.f32.vlgmr.msra.gmra.mrb[2].mxu0 %vm146_vm0, %v119_v29  ;;  %2974 = vmatmul.mubr.msk.f32.vlgmr.msra.gmra.mrb[2].mxu1 %vm146_vm0, %v121_v30  ;;  %v129_v53 = vld [vmem:[#allocation5 + $0x78] sm:$0xff]  ;;  %v3576_v55 = vld [vmem:[#allocation2 + $0xa0] sm:$0xff]  ;;  %v3578_v56 = vld [vmem:[#allocation2 + $0xa8] sm:$0xff]  ;;  %v1928_v30 = vsel %vm146_vm0, %v3512_v14, -inf }
  0x33   :  { %3081 = vmatprep.subr.bf16.mxu1 %v3080_v32  ;;  %3079 = vmatpush3.bf16.msra.mxu0 %v3076_v28  ;;  %v3584_v58 = vld [vmem:[#allocation2 + $0xb0] sm:$0xff]  ;;  %v3586_v59 = vld [vmem:[#allocation2 + $0xb8] sm:$0xff]  ;;  %v1967_v61 = vsel %vm146_vm0, %v3576_v55, -inf  ;;  %v3100_v62 = vpack.c.bf16 %v3578_v56, %v3576_v55  ;;  %v130_v63 = vld [vmem:[#allocation5 + $0x80] sm:$0xff]  ;;  %v1970_v9 = vsel %vm146_vm0, %v3578_v56, -inf }
  0x34   :  { %3083 = vmatpush3.bf16.msra.mxu1 %v3080_v32  ;;  %1959 = vmax.xlane.f32.xlu1 %v1958_v36  ;;  %v132_v60 = vld [vmem:[#allocation5 + $0x90] sm:$0xff]  ;;  %v131_v3 = vld [vmem:[#allocation5 + $0x88] sm:$0xff]  ;;  %v133_v4 = vld [vmem:[#allocation5 + $0x98] sm:$0xff]  ;;  %v3104_v6 = vpack.c.bf16 %v3586_v59, %v3584_v58 }
  0x35   :  { %2987 = vmatprep.mubr.msk.f32.mxu1 %vm146_vm0, %v124_v39  ;;  %1962 = vmax.xlane.f32.xlu0 %v1961_v40  ;;  %v3596_v7 = vld [vmem:[#allocation2 + $0xc0] sm:$0xff]  ;;  %v3598_v8 = vld [vmem:[#allocation2 + $0xc8] sm:$0xff]  ;;  %v3604_v11 = vld [vmem:[#allocation2 + $0xd0] sm:$0xff]  ;;  %v1973_v40 = vsel %vm146_vm0, %v3584_v58, -inf }
  0x36   :  { %2980 = vmatprep.mubr.msk.f32.mxu0 %vm146_vm0, %v122_v42  ;;  %3085 = vmatprep.subr.bf16.mxu0 %v3084_v41  ;;  %v3606_v15 = vld [vmem:[#allocation2 + $0xd8] sm:$0xff]  ;;  %v136_v16 = vld [vmem:[#allocation5 + $0xb0] sm:$0xff]  ;;  %v3108_v19 = vpack.c.bf16 %v3598_v8, %v3596_v7  ;;  %v134_v21 = vld [vmem:[#allocation5 + $0xa0] sm:$0xff] }
  0x37   :  { %2981 = vmatmul.mubr.msk.f32.vlgmr.msra.gmra.mrb[4].mxu0 %vm146_vm0, %v123_v44  ;;  %2988 = vmatmul.mubr.msk.f32.vlgmr.msra.gmra.mrb[4].mxu1 %vm146_vm0, %v125_v45  ;;  %v135_v25 = vld [vmem:[#allocation5 + $0xa8] sm:$0xff]  ;;  %v137_v26 = vld [vmem:[#allocation5 + $0xb8] sm:$0xff]  ;;  %v3112_v27 = vpack.c.bf16 %v3606_v15, %v3604_v11  ;;  %v3616_v28 = vld [vmem:[#allocation2 + $0xe0] sm:$0xff] }
  0x38   :  { %3089 = vmatprep.subr.bf16.mxu1 %v3088_v46  ;;  %3087 = vmatpush3.bf16.msra.mxu0 %v3084_v41  ;;  %v3618_v29 = vld [vmem:[#allocation2 + $0xe8] sm:$0xff]  ;;  %v3624_v32 = vld [vmem:[#allocation2 + $0xf0] sm:$0xff]  ;;  %v3626_v36 = vld [vmem:[#allocation2 + $0xf8] sm:$0xff] }
  0x39   :  { %3091 = vmatpush3.bf16.msra.mxu1 %v3088_v46  ;;  %1965 = vmax.xlane.f32.xlu1 %v1964_v47  ;;  %v140_v39 = vld [vmem:[#allocation5 + $0xd0] sm:$0xff]  ;;  %v3116_v41 = vpack.c.bf16 %v3618_v29, %v3616_v28  ;;  %v138_v42 = vld [vmem:[#allocation5 + $0xc0] sm:$0xff]  ;;  %v139_v44 = vld [vmem:[#allocation5 + $0xc8] sm:$0xff]  ;;  %v3120_v46 = vpack.c.bf16 %v3626_v36, %v3624_v32  ;;  %v1976_v47 = vsel %vm146_vm0, %v3586_v59, -inf }
  0x3a   :  { %3001 = vmatprep.mubr.msk.f32.mxu1 %vm146_vm0, %v128_v48  ;;  %1920 = vmax.xlane.f32.xlu0 %v1919_v49  ;;  %v141_v45 = vld [vmem:[#allocation5 + $0xd8] sm:$0xff]  ;;  %v144_v48 = vld [vmem:[#allocation5 + $0xf0] sm:$0xff]  ;;  %v1931_v49 = vsel %vm146_vm0, %v3520_v20, -inf }
  0x3b   :  { %2994 = vmatprep.mubr.msk.f32.mxu0 %vm146_vm0, %v126_v51  ;;  %3093 = vmatprep.subr.bf16.mxu0 %v3092_v50  ;;  %v143_v51 = vld [vmem:[#allocation5 + $0xe8] sm:$0xff] }
  0x3c   :  { %2995 = vmatmul.mubr.msk.f32.vlgmr.msra.gmra.mrb[6].mxu0 %vm146_vm0, %v127_v52  ;;  %3002 = vmatmul.mubr.msk.f32.vlgmr.msra.gmra.mrb[6].mxu1 %vm146_vm0, %v129_v53  ;;  %v145_v52 = vld [vmem:[#allocation5 + $0xf8] sm:$0xff]  ;;  %v1934_v53 = vsel %vm146_vm0, %v3524_v22, -inf }
  0x3d   :  { %3097 = vmatprep.subr.bf16.mxu1 %v3096_v54  ;;  %3095 = vmatpush3.bf16.msra.mxu0 %v3092_v50  ;;  %v142_v50 = vld [vmem:[#allocation5 + $0xe0] sm:$0xff] }
  0x3e   :  { %3099 = vmatpush3.bf16.msra.mxu1 %v3096_v54  ;;  %1923 = vmax.xlane.f32.xlu1 %v1922_v57  ;;  %v1979_v54 = vsel %vm146_vm0, %v3596_v7, -inf  ;;  %v1982_v57 = vsel %vm146_vm0, %v3598_v8, -inf }
  0x3f   :  { %3015 = vmatprep.mubr.msk.f32.mxu1 %vm146_vm0, %v132_v60  ;;  %1968 = vmax.xlane.f32.xlu0 %v1967_v61  ;;  %v1937_v60 = vsel %vm146_vm0, %v3526_v23, -inf  ;;  %v1940_v61 = vsel %vm146_vm0, %v3528_v24, -inf }
  0x40   :  { %3008 = vmatprep.mubr.msk.f32.mxu0 %vm146_vm0, %v130_v63  ;;  %3101 = vmatprep.subr.bf16.mxu0 %v3100_v62  ;;  %v1988_v63 = vsel %vm146_vm0, %v3606_v15, -inf }
  0x41   :  { %3009 = vmatmul.mubr.msk.f32.vlgmr.msra.gmra.mrb[8].mxu0 %vm146_vm0, %v131_v3  ;;  %3016 = vmatmul.mubr.msk.f32.vlgmr.msra.gmra.mrb[8].mxu1 %vm146_vm0, %v133_v4  ;;  %v1943_v3 = vsel %vm146_vm0, %v3542_v34, -inf  ;;  %v1946_v4 = vsel %vm146_vm0, %v3544_v35, -inf }
  0x42   :  { %3105 = vmatprep.subr.bf16.mxu1 %v3104_v6  ;;  %3103 = vmatpush3.bf16.msra.mxu0 %v3100_v62  ;;  %v1985_v62 = vsel %vm146_vm0, %v3604_v11, -inf }
  0x43   :  { %3107 = vmatpush3.bf16.msra.mxu1 %v3104_v6  ;;  %1971 = vmax.xlane.f32.xlu1 %v1970_v9  ;;  %v1991_v6 = vsel %vm146_vm0, %v3616_v28, -inf  ;;  %v1994_v9 = vsel %vm146_vm0, %v3618_v29, -inf }
  0x44   :  { %3029 = vmatprep.mubr.msk.f32.mxu1 %vm146_vm0, %v136_v16  ;;  %1926 = vmax.xlane.f32.xlu0 %v1925_v17  ;;  %v1949_v16 = vsel %vm146_vm0, %v3550_v37, -inf  ;;  %v1952_v17 = vsel %vm146_vm0, %v3552_v38, -inf }
  0x45   :  { %3022 = vmatprep.mubr.msk.f32.mxu0 %vm146_vm0, %v134_v21  ;;  %3109 = vmatprep.subr.bf16.mxu0 %v3108_v19  ;;  %v2000_v21 = vsel %vm146_vm0, %v3626_v36, -inf }
  0x46   :  { %3023 = vmatmul.mubr.msk.f32.vlgmr.msra.gmra.mrb[10].mxu0 %vm146_vm0, %v135_v25  ;;  %3030 = vmatmul.mubr.msk.f32.vlgmr.msra.gmra.mrb[10].mxu1 %vm146_vm0, %v137_v26 }
  0x47   :  { %3113 = vmatprep.subr.bf16.mxu1 %v3112_v27  ;;  %3111 = vmatpush3.bf16.msra.mxu0 %v3108_v19  ;;  %v1997_v19 = vsel %vm146_vm0, %v3624_v32, -inf }
  0x48   :  { %3115 = vmatpush3.bf16.msra.mxu1 %v3112_v27  ;;  %1929 = vmax.xlane.f32.xlu1 %v1928_v30 }
  0x49   :  { %3043 = vmatprep.mubr.msk.f32.mxu1 %vm146_vm0, %v140_v39  ;;  %1974 = vmax.xlane.f32.xlu0 %v1973_v40 }
  0x4a   :  { %3036 = vmatprep.mubr.msk.f32.mxu0 %vm146_vm0, %v138_v42  ;;  %3117 = vmatprep.subr.bf16.mxu0 %v3116_v41 }
  0x4b   :  { %3037 = vmatmul.mubr.msk.f32.vlgmr.msra.gmra.mrb[12].mxu0 %vm146_vm0, %v139_v44  ;;  %3044 = vmatmul.mubr.msk.f32.vlgmr.msra.gmra.mrb[12].mxu1 %vm146_vm0, %v141_v45 }
  0x4c   :  { %3121 = vmatprep.subr.bf16.mxu1 %v3120_v46  ;;  %3119 = vmatpush3.bf16.msra.mxu0 %v3116_v41 }
  0x4d   :  { %3123 = vmatpush3.bf16.msra.mxu1 %v3120_v46  ;;  %1977 = vmax.xlane.f32.xlu1 %v1976_v47 }
  0x4e   :  { %3057 = vmatprep.mubr.msk.f32.mxu1 %vm146_vm0, %v144_v48  ;;  %1932 = vmax.xlane.f32.xlu0 %v1931_v49 }
  0x4f   :  { %3050 = vmatprep.mubr.msk.f32.mxu0 %vm146_vm0, %v142_v50 }
  0x50   :  { %3051 = vmatmul.mubr.msk.f32.vlgmr.msra.gmra.mrb[14].mxu0 %vm146_vm0, %v143_v51  ;;  %3058 = vmatmul.mubr.msk.f32.vlgmr.msra.gmra.mrb[14].mxu1 %vm146_vm0, %v145_v52 }
  0x51   :  { %1935 = vmax.xlane.f32.xlu1 %v1934_v53 }
  0x52   :  { %1980 = vmax.xlane.f32.xlu0 %v1979_v54 }
  0x55   :  { %1983 = vmax.xlane.f32.xlu1 %v1982_v57 }
  0x56   :  { %1938 = vmax.xlane.f32.xlu0 %v1937_v60 }
  0x59   :  { %1941 = vmax.xlane.f32.xlu1 %v1940_v61 }
  0x5a   :  { %1986 = vmax.xlane.f32.xlu0 %v1985_v62 }
  0x5d   :  { %1989 = vmax.xlane.f32.xlu1 %v1988_v63 }
  0x5e   :  { %1944 = vmax.xlane.f32.xlu0 %v1943_v3 }
  0x61   :  { %1947 = vmax.xlane.f32.xlu1 %v1946_v4 }
  0x62   :  { %1992 = vmax.xlane.f32.xlu0 %v1991_v6 }
  0x65   :  { %1995 = vmax.xlane.f32.xlu1 %v1994_v9 }
  0x66   :  { %1950 = vmax.xlane.f32.xlu0 %v1949_v16 }
  0x69   :  { %1953 = vmax.xlane.f32.xlu1 %v1952_v17 }
  0x6a   :  { %1998 = vmax.xlane.f32.xlu0 %v1997_v19 }
  0x6d   :  { %2001 = vmax.xlane.f32.xlu1 %v2000_v21 }
  0xb5   :  { %v3678_v25 = vpop.xlane.xlu0 %1908 }
  0xb6   :  { %v2003_v26 = vsub.f32 %v3486_v0, %v3678_v25 }
  0xb8   :  { %v2035_v27 = vmul.f32 1.442695, %v2003_v26  ;;  %v3682_v30 = vpop.xlane.xlu1 %1914 }
  0xb9   :  { %4497 = vst [vmem:[#allocation11_spill] sm:$0xff] %v3682_v30  ;;  %v2005_v39 = vsub.f32 %v3490_v2, %v3682_v30  ;;  %v3686_v40 = vpop.xlane.xlu0 %1911 }
  0xba   :  { %3138 = vpow2.f32 %v2035_v27  ;;  %v2004_v41 = vsub.f32 %v3488_v1, %v3686_v40 }
  0xbb   :  { %v2039_v42 = vmul.f32 1.442695, %v2005_v39 }
  0xbc   :  { %v2037_v44 = vmul.f32 1.442695, %v2004_v41  ;;  %v3690_v45 = vpop.xlane.xlu1 %1917 }
  0xbd   :  { %4498 = vst [vmem:[#allocation12_spill] sm:$0xff] %v3690_v45  ;;  %3140 = vpow2.f32 %v2039_v42  ;;  %v2006_v0 = vsub.f32 %v3496_v5, %v3690_v45  ;;  %v3694_v46 = vpop.xlane.xlu0 %1956 }
  0xbe   :  { %4499 = vst [vmem:[#allocation13_spill] sm:$0xff] %v3694_v46  ;;  %3142 = vpow2.f32 %v2037_v44  ;;  %v2019_v2 = vsub.f32 %v3518_v18, %v3694_v46 }
  0xbf   :  { %v2041_v47 = vmul.f32 1.442695, %v2006_v0 }
  0xc0   :  { %v2067_v48 = vmul.f32 1.442695, %v2019_v2 }
  0xc1   :  { %3144 = vpow2.f32 %v2041_v47  ;;  %v3698_v49 = vpop.xlane.xlu1 %1959 }
  0xc2   :  { %4500 = vst [vmem:[#allocation14_spill] sm:$0xff] %v3698_v49  ;;  %3146 = vpow2.f32 %v2067_v48  ;;  %v2020_v1 = vsub.f32 %v3536_v31, %v3698_v49  ;;  %v3702_v50 = vpop.xlane.xlu0 %1962 }
  0xc3   :  { %4501 = vst [vmem:[#allocation15_spill] sm:$0xff] %v3702_v50  ;;  %v2021_v5 = vsub.f32 %v3540_v33, %v3702_v50 }
  0xc4   :  { %v3139_v51 = vpop.eup %3138  ;;  %v2069_v52 = vmul.f32 1.442695, %v2020_v1 }
  0xc5   :  { %v2071_v53 = vmul.f32 1.442695, %v2021_v5  ;;  %v2099_v54 = vsel %vm146_vm0, %v3139_v51, 0.0 }
  0xc6   :  { %3148 = vpow2.f32 %v2069_v52  ;;  %v3707_v18 = vpop.xlane.xlu1 %1965  ;;  %2100 = vadd.xlane.f32.xlu0 %v2099_v54 }
  0xc7   :  { %4502 = vst [vmem:[#allocation16_spill] sm:$0xff] %v3707_v18  ;;  %v3141_v57 = vpop.eup %3140  ;;  %3150 = vpow2.f32 %v2071_v53  ;;  %v2022_v60 = vsub.f32 %v3560_v43, %v3707_v18  ;;  %v3711_v31 = vpop.xlane.xlu0 %1920 }
  0xc8   :  { %4503 = vst [vmem:[#allocation17_spill] sm:$0xff] %v3711_v31  ;;  %v3143_v61 = vpop.eup %3142  ;;  %v2007_v33 = vsub.f32 %v3503_v10, %v3711_v31  ;;  %v2105_v62 = vsel %vm146_vm0, %v3141_v57, 0.0 }
  0xc9   :  { %v2073_v63 = vmul.f32 1.442695, %v2022_v60  ;;  %v2102_v3 = vsel %vm146_vm0, %v3143_v61, 0.0 }
  0xca   :  { %v2043_v4 = vmul.f32 1.442695, %v2007_v33  ;;  %2106 = vadd.xlane.f32.xlu0 %v2105_v62  ;;  %2103 = vadd.xlane.f32.xlu1 %v2102_v3 }
  0xcb   :  { %v3145_v6 = vpop.eup %3144  ;;  %3152 = vpow2.f32 %v2073_v63  ;;  %v3717_v9 = vpop.xlane.xlu1 %1923 }
  0xcc   :  { %4504 = vst [vmem:[#allocation18_spill] sm:$0xff] %v3717_v9  ;;  %v3147_v16 = vpop.eup %3146  ;;  %3154 = vpow2.f32 %v2043_v4  ;;  %v2008_v43 = vsub.f32 %v3508_v12, %v3717_v9  ;;  %v3721_v17 = vpop.xlane.xlu0 %1968  ;;  %v2108_v10 = vsel %vm146_vm0, %v3145_v6, 0.0 }
  0xcd   :  { %4505 = vst [vmem:[#allocation19_spill] sm:$0xff] %v3721_v17  ;;  %v2023_v19 = vsub.f32 %v3576_v55, %v3721_v17  ;;  %v2147_v21 = vsel %vm146_vm0, %v3147_v16, 0.0 }
  0xce   :  { %v2045_v26 = vmul.f32 1.442695, %v2008_v43  ;;  %2109 = vadd.xlane.f32.xlu1 %v2108_v10  ;;  %2148 = vadd.xlane.f32.xlu0 %v2147_v21 }
  0xcf   :  { %v2075_v27 = vmul.f32 1.442695, %v2023_v19 }
  0xd0   :  { %v3149_v39 = vpop.eup %3148  ;;  %3156 = vpow2.f32 %v2045_v26  ;;  %v3727_v41 = vpop.xlane.xlu1 %1971 }
  0xd1   :  { %4506 = vst [vmem:[#allocation20_spill] sm:$0xff] %v3727_v41  ;;  %v3151_v42 = vpop.eup %3150  ;;  %3158 = vpow2.f32 %v2075_v27  ;;  %v2024_v12 = vsub.f32 %v3578_v56, %v3727_v41  ;;  %v3731_v44 = vpop.xlane.xlu0 %1926  ;;  %v2150_v0 = vsel %vm146_vm0, %v3149_v39, 0.0 }
  0xd2   :  { %4507 = vst [vmem:[#allocation21_spill] sm:$0xff] %v3731_v44  ;;  %v2009_v55 = vsub.f32 %v3510_v13, %v3731_v44  ;;  %2151 = vadd.xlane.f32.xlu1 %v2150_v0  ;;  %v2153_v2 = vsel %vm146_vm0, %v3151_v42, 0.0 }
  0xd3   :  { %v2077_v47 = vmul.f32 1.442695, %v2024_v12  ;;  %2154 = vadd.xlane.f32.xlu0 %v2153_v2 }
  0xd4   :  { %v2047_v48 = vmul.f32 1.442695, %v2009_v55 }
  0xd5   :  { %v3153_v1 = vpop.eup %3152  ;;  %3160 = vpow2.f32 %v2077_v47  ;;  %v3737_v5 = vpop.xlane.xlu1 %1929 }
  0xd6   :  { %4508 = vst [vmem:[#allocation22_spill] sm:$0xff] %v3737_v5  ;;  %v3155_v51 = vpop.eup %3154  ;;  %3162 = vpow2.f32 %v2047_v48  ;;  %v2010_v56 = vsub.f32 %v3512_v14, %v3737_v5  ;;  %v3741_v52 = vpop.xlane.xlu0 %1974  ;;  %v2156_v53 = vsel %vm146_vm0, %v3153_v1, 0.0 }
  0xd7   :  { %4509 = vst [vmem:[#allocation23_spill] sm:$0xff] %v3741_v52  ;;  %v2025_v13 = vsub.f32 %v3584_v58, %v3741_v52  ;;  %2157 = vadd.xlane.f32.xlu1 %v2156_v53  ;;  %v2111_v54 = vsel %vm146_vm0, %v3155_v51, 0.0 }
  0xd8   :  { %v2049_v57 = vmul.f32 1.442695, %v2010_v56  ;;  %2112 = vadd.xlane.f32.xlu0 %v2111_v54 }
  0xd9   :  { %v2079_v60 = vmul.f32 1.442695, %v2025_v13 }
  0xda   :  { %v3157_v61 = vpop.eup %3156  ;;  %3164 = vpow2.f32 %v2049_v57  ;;  %v3747_v33 = vpop.xlane.xlu1 %1977 }
  0xdb   :  { %4510 = vst [vmem:[#allocation24_spill] sm:$0xff] %v3747_v33  ;;  %v3159_v62 = vpop.eup %3158  ;;  %3166 = vpow2.f32 %v2079_v60  ;;  %v2026_v14 = vsub.f32 %v3586_v59, %v3747_v33  ;;  %v3751_v63 = vpop.xlane.xlu0 %1932  ;;  %v2114_v3 = vsel %vm146_vm0, %v3157_v61, 0.0 }
  0xdc   :  { %4511 = vst [vmem:[#allocation25_spill] sm:$0xff] %v3751_v63  ;;  %v2011_v58 = vsub.f32 %v3520_v20, %v3751_v63  ;;  %2115 = vadd.xlane.f32.xlu1 %v2114_v3  ;;  %v2159_v4 = vsel %vm146_vm0, %v3159_v62, 0.0 }
  0xdd   :  { %v2081_v6 = vmul.f32 1.442695, %v2026_v14  ;;  %2160 = vadd.xlane.f32.xlu0 %v2159_v4 }
  0xde   :  { %v2051_v16 = vmul.f32 1.442695, %v2011_v58  ;;  %v3757_v43 = vpop.xlane.xlu1 %1935 }
  0xdf   :  { %4512 = vst [vmem:[#allocation26_spill] sm:$0xff] %v3757_v43  ;;  %v3161_v10 = vpop.eup %3160  ;;  %3168 = vpow2.f32 %v2081_v6  ;;  %v2012_v59 = vsub.f32 %v3524_v22, %v3757_v43  ;;  %v3761_v19 = vpop.xlane.xlu0 %1980 }
  0xe0   :  { %4513 = vst [vmem:[#allocation27_spill] sm:$0xff] %v3761_v19  ;;  %v3163_v21 = vpop.eup %3162  ;;  %3170 = vpow2.f32 %v2051_v16  ;;  %v2027_v20 = vsub.f32 %v3596_v7, %v3761_v19  ;;  %v2162_v26 = vsel %vm146_vm0, %v3161_v10, 0.0 }
  0xe1   :  { %v2053_v27 = vmul.f32 1.442695, %v2012_v59  ;;  %2163 = vadd.xlane.f32.xlu1 %v2162_v26  ;;  %v2117_v39 = vsel %vm146_vm0, %v3163_v21, 0.0 }
  0xe2   :  { %v2083_v42 = vmul.f32 1.442695, %v2027_v20  ;;  %v3767_v12 = vpop.xlane.xlu1 %1983  ;;  %2118 = vadd.xlane.f32.xlu0 %v2117_v39 }
  0xe3   :  { %4514 = vst [vmem:[#allocation28_spill] sm:$0xff] %v3767_v12  ;;  %3172 = vpow2.f32 %v2053_v27  ;;  %v2028_v22 = vsub.f32 %v3598_v8, %v3767_v12  ;;  %v3771_v0 = vpop.xlane.xlu0 %1938 }
  0xe4   :  { %4515 = vst [vmem:[#allocation29_spill] sm:$0xff] %v3771_v0  ;;  %v3165_v55 = vpop.eup %3164  ;;  %3174 = vpow2.f32 %v2083_v42  ;;  %v2013_v7 = vsub.f32 %v3526_v23, %v3771_v0 }
  0xe5   :  { %v3167_v2 = vpop.eup %3166  ;;  %v2085_v47 = vmul.f32 1.442695, %v2028_v22  ;;  %v2120_v48 = vsel %vm146_vm0, %v3165_v55, 0.0 }
  0xe6   :  { %v2055_v1 = vmul.f32 1.442695, %v2013_v7  ;;  %v3776_v51 = vpop.xlane.xlu1 %1941  ;;  %2121 = vadd.xlane.f32.xlu1 %v2120_v48  ;;  %v2165_v56 = vsel %vm146_vm0, %v3167_v2, 0.0 }
  0xe7   :  { %4516 = vst [vmem:[#allocation30_spill] sm:$0xff] %v3776_v51  ;;  %3176 = vpow2.f32 %v2085_v47  ;;  %v2014_v8 = vsub.f32 %v3528_v24, %v3776_v51  ;;  %v3781_v53 = vpop.xlane.xlu0 %1986  ;;  %2166 = vadd.xlane.f32.xlu0 %v2165_v56 }
  0xe8   :  { %4517 = vst [vmem:[#allocation31_spill] sm:$0xff] %v3781_v53  ;;  %3178 = vpow2.f32 %v2055_v1  ;;  %v2029_v23 = vsub.f32 %v3604_v11, %v3781_v53 }
  0xe9   :  { %v3169_v13 = vpop.eup %3168  ;;  %v2057_v54 = vmul.f32 1.442695, %v2014_v8 }
  0xea   :  { %v3171_v57 = vpop.eup %3170  ;;  %v2087_v60 = vmul.f32 1.442695, %v2029_v23  ;;  %v3785_v61 = vpop.xlane.xlu1 %1989  ;;  %v2168_v62 = vsel %vm146_vm0, %v3169_v13, 0.0 }
  0xeb   :  { %4518 = vst [vmem:[#allocation32_spill] sm:$0xff] %v3785_v61  ;;  %3180 = vpow2.f32 %v2057_v54  ;;  %v2030_v14 = vsub.f32 %v3606_v15, %v3785_v61  ;;  %v3790_v24 = vpop.xlane.xlu0 %1944  ;;  %2169 = vadd.xlane.f32.xlu1 %v2168_v62  ;;  %v2123_v3 = vsel %vm146_vm0, %v3171_v57, 0.0 }
  0xec   :  { %4519 = vst [vmem:[#allocation33_spill] sm:$0xff] %v3790_v24  ;;  %3182 = vpow2.f32 %v2087_v60  ;;  %v2015_v11 = vsub.f32 %v3542_v34, %v3790_v24  ;;  %2124 = vadd.xlane.f32.xlu0 %v2123_v3 }
  0xed   :  { %v3173_v58 = vpop.eup %3172  ;;  %v2089_v4 = vmul.f32 1.442695, %v2030_v14 }
  0xee   :  { %v3175_v6 = vpop.eup %3174  ;;  %v2059_v16 = vmul.f32 1.442695, %v2015_v11  ;;  %v3795_v10 = vpop.xlane.xlu1 %1947  ;;  %v2126_v59 = vsel %vm146_vm0, %v3173_v58, 0.0 }
  0xef   :  { %4520 = vst [vmem:[#allocation34_spill] sm:$0xff] %v3795_v10  ;;  %3184 = vpow2.f32 %v2089_v4  ;;  %v2016_v15 = vsub.f32 %v3544_v35, %v3795_v10  ;;  %v3800_v21 = vpop.xlane.xlu0 %1992  ;;  %2127 = vadd.xlane.f32.xlu1 %v2126_v59  ;;  %v2171_v20 = vsel %vm146_vm0, %v3175_v6, 0.0 }
  0xf0   :  { %4521 = vst [vmem:[#allocation35_spill] sm:$0xff] %v3800_v21  ;;  %3186 = vpow2.f32 %v2059_v16  ;;  %v2031_v34 = vsub.f32 %v3616_v28, %v3800_v21  ;;  %2172 = vadd.xlane.f32.xlu0 %v2171_v20 }
  0xf1   :  { %v3177_v26 = vpop.eup %3176  ;;  %v2061_v27 = vmul.f32 1.442695, %v2016_v15 }
  0xf2   :  { %v3179_v39 = vpop.eup %3178  ;;  %v2091_v42 = vmul.f32 1.442695, %v2031_v34  ;;  %v3805_v22 = vpop.xlane.xlu1 %1995  ;;  %v2174_v55 = vsel %vm146_vm0, %v3177_v26, 0.0 }
  0xf3   :  { %4522 = vst [vmem:[#allocation36_spill] sm:$0xff] %v3805_v22  ;;  %3188 = vpow2.f32 %v2061_v27  ;;  %v2032_v35 = vsub.f32 %v3618_v29, %v3805_v22  ;;  %v3810_v7 = vpop.xlane.xlu0 %1950  ;;  %2175 = vadd.xlane.f32.xlu1 %v2174_v55  ;;  %v2129_v2 = vsel %vm146_vm0, %v3179_v39, 0.0 }
  0xf4   :  { %4523 = vst [vmem:[#allocation37_spill] sm:$0xff] %v3810_v7  ;;  %3190 = vpow2.f32 %v2091_v42  ;;  %v2017_v28 = vsub.f32 %v3550_v37, %v3810_v7  ;;  %2130 = vadd.xlane.f32.xlu0 %v2129_v2 }
  0xf5   :  { %v3181_v47 = vpop.eup %3180  ;;  %v2093_v48 = vmul.f32 1.442695, %v2032_v35 }
  0xf6   :  { %v3183_v1 = vpop.eup %3182  ;;  %v2063_v56 = vmul.f32 1.442695, %v2017_v28  ;;  %v3815_v8 = vpop.xlane.xlu1 %1953  ;;  %v2132_v23 = vsel %vm146_vm0, %v3181_v47, 0.0 }
  0xf7   :  { %4524 = vst [vmem:[#allocation38_spill] sm:$0xff] %v3815_v8  ;;  %3192 = vpow2.f32 %v2093_v48  ;;  %v2018_v29 = vsub.f32 %v3552_v38, %v3815_v8  ;;  %v3820_v13 = vpop.xlane.xlu0 %1998  ;;  %2133 = vadd.xlane.f32.xlu1 %v2132_v23  ;;  %v2177_v54 = vsel %vm146_vm0, %v3183_v1, 0.0 }
  0xf8   :  { %4525 = vst [vmem:[#allocation39_spill] sm:$0xff] %v3820_v13  ;;  %3194 = vpow2.f32 %v2063_v56  ;;  %v2033_v37 = vsub.f32 %v3624_v32, %v3820_v13  ;;  %2178 = vadd.xlane.f32.xlu0 %v2177_v54 }
  0xf9   :  { %v3185_v57 = vpop.eup %3184  ;;  %v2065_v60 = vmul.f32 1.442695, %v2018_v29 }
  0xfa   :  { %v3187_v62 = vpop.eup %3186  ;;  %v2095_v14 = vmul.f32 1.442695, %v2033_v37  ;;  %v3825_v3 = vpop.xlane.xlu1 %2001  ;;  %v2180_v11 = vsel %vm146_vm0, %v3185_v57, 0.0 }
  0xfb   :  { %4526 = vst [vmem:[#allocation40_spill] sm:$0xff] %v3825_v3  ;;  %3196 = vpow2.f32 %v2065_v60  ;;  %v2034_v38 = vsub.f32 %v3626_v36, %v3825_v3  ;;  %2181 = vadd.xlane.f32.xlu1 %v2180_v11  ;;  %v2135_v58 = vsel %vm146_vm0, %v3187_v62, 0.0 }
  0xfc   :  { %3198 = vpow2.f32 %v2095_v14  ;;  %2136 = vadd.xlane.f32.xlu0 %v2135_v58 }
  0xfd   :  { %v3189_v4 = vpop.eup %3188  ;;  %v2097_v32 = vmul.f32 1.442695, %v2034_v38 }
  0xfe   :  { %v3191_v6 = vpop.eup %3190  ;;  %v2138_v16 = vsel %vm146_vm0, %v3189_v4, 0.0 }
  0xff   :  { %3200 = vpow2.f32 %v2097_v32  ;;  %2139 = vadd.xlane.f32.xlu1 %v2138_v16  ;;  %v2183_v59 = vsel %vm146_vm0, %v3191_v6, 0.0 }
 0x100   :  { %2184 = vadd.xlane.f32.xlu0 %v2183_v59  ;;  %v2954_v15 = vpop.f32.mrb[0].mxu0 }
 0x101   :  { %v3193_v20 = vpop.eup %3192  ;;  %v3833_v34 = vmul.f32 0.0625, %v2954_v15  ;;  %v2961_v36 = vpop.f32.mrb[0].mxu1 }
 0x102   :  { %v219_v26 = vpop.f32.mrb[1].mxu0  ;;  %v3195_v27 = vpop.eup %3194  ;;  %v2186_v39 = vsel %vm146_vm0, %v3193_v20, 0.0  ;;  %v3836_v42 = vmul.f32 0.0625, %v2961_v36 }
 0x103   :  { %v3838_v55 = vmul.f32 0.0625, %v219_v26  ;;  %v300_v35 = vpop.f32.mrb[1].mxu1  ;;  %2187 = vadd.xlane.f32.xlu1 %v2186_v39  ;;  %v2141_v2 = vsel %vm146_vm0, %v3195_v27, 0.0  ;;  %v1476_v28 = vsel %vm146_vm0, %v3833_v34, -inf }
 0x104   :  { %v3843_v47 = vmul.f32 0.0625, %v300_v35  ;;  %2142 = vadd.xlane.f32.xlu0 %v2141_v2  ;;  %v1485_v48 = vsel %vm146_vm0, %v3836_v42, -inf }
 0x105   :  { %v1475_v1 = vsel %vm146_vm0, %v3838_v55, -inf  ;;  %v3197_v56 = vpop.eup %3196  ;;  %v2968_v54 = vpop.f32.mrb[2].mxu0 }
 0x106   :  { %v1477_v23 = vmax.f32 %v1475_v1, %v1476_v28  ;;  %v1484_v29 = vsel %vm146_vm0, %v3843_v47, -inf  ;;  %v2975_v37 = vpop.f32.mrb[2].mxu1  ;;  %v3199_v57 = vpop.eup %3198  ;;  %v2144_v62 = vsel %vm146_vm0, %v3197_v56, 0.0  ;;  %v3852_v14 = vmul.f32 0.0625, %v2968_v54 }
 0x107   :  { %v1486_v60 = vmax.f32 %v1484_v29, %v1485_v48  ;;  %v3854_v11 = vmul.f32 0.0625, %v2975_v37  ;;  %v381_v38 = vpop.f32.mrb[3].mxu0  ;;  %v462_v58 = vpop.f32.mrb[3].mxu1  ;;  %2145 = vadd.xlane.f32.xlu1 %v2144_v62  ;;  %v2189_v32 = vsel %vm146_vm0, %v3199_v57, 0.0 }
 0x108   :  { %v1478_v4 = vrot.slane %v1477_v23, 4  ;;  %v3857_v6 = vmul.f32 0.0625, %v381_v38  ;;  %v3859_v16 = vmul.f32 0.0625, %v462_v58  ;;  %2190 = vadd.xlane.f32.xlu0 %v2189_v32  ;;  %v1494_v15 = vsel %vm146_vm0, %v3852_v14, -inf }
 0x109   :  { %v1487_v59 = vrot.slane %v1486_v60, 4  ;;  %v1503_v20 = vsel %vm146_vm0, %v3854_v11, -inf  ;;  %v3201_v36 = vpop.eup %3200 }
 0x10a   :  { %v1479_v26 = vmax.f32 %v1477_v23, %v1478_v4  ;;  %v1493_v27 = vsel %vm146_vm0, %v3857_v6, -inf  ;;  %v1502_v39 = vsel %vm146_vm0, %v3859_v16, -inf  ;;  %v2192_v48 = vsel %vm146_vm0, %v3201_v36, 0.0  ;;  %v2982_v1 = vpop.f32.mrb[4].mxu0  ;;  %v2989_v56 = vpop.f32.mrb[4].mxu1 }
 0x10b   :  { %v1488_v35 = vmax.f32 %v1486_v60, %v1487_v59  ;;  %v1495_v2 = vmax.f32 %v1493_v27, %v1494_v15  ;;  %v1504_v28 = vmax.f32 %v1502_v39, %v1503_v20  ;;  %2193 = vadd.xlane.f32.xlu1 %v2192_v48  ;;  %v3870_v54 = vmul.f32 0.0625, %v2982_v1  ;;  %v543_v23 = vpop.f32.mrb[5].mxu0  ;;  %v624_v57 = vpop.f32.mrb[5].mxu1 }
 0x10c   :  { %v1480_v29 = vrot.slane %v1479_v26, 2  ;;  %v3872_v37 = vmul.f32 0.0625, %v2989_v56  ;;  %v3874_v4 = vmul.f32 0.0625, %v543_v23  ;;  %v3880_v15 = vmul.f32 0.0625, %v624_v57 }
 0x10d   :  { %v1489_v62 = vrot.slane %v1488_v35, 2  ;;  %v1496_v38 = vrot.slane %v1495_v2, 4  ;;  %v1505_v58 = vrot.slane %v1504_v28, 4  ;;  %v1512_v32 = vsel %vm146_vm0, %v3870_v54, -inf }
 0x10e   :  { %v1481_v60 = vmax.f32 %v1479_v26, %v1480_v29  ;;  %v1521_v59 = vsel %vm146_vm0, %v3872_v37, -inf  ;;  %v1511_v39 = vsel %vm146_vm0, %v3874_v4, -inf  ;;  %v1520_v56 = vsel %vm146_vm0, %v3880_v15, -inf }
 0x10f   :  { %v1490_v20 = vmax.f32 %v1488_v35, %v1489_v62  ;;  %v1497_v36 = vmax.f32 %v1495_v2, %v1496_v38  ;;  %v1506_v27 = vmax.f32 %v1504_v28, %v1505_v58  ;;  %v1513_v1 = vmax.f32 %v1511_v39, %v1512_v32  ;;  %v2996_v26 = vpop.f32.mrb[6].mxu0  ;;  %v3003_v29 = vpop.f32.mrb[6].mxu1 }
 0x110   :  { %v1482_v48 = vrot.slane %v1481_v60, 1  ;;  %v1522_v13 = vmax.f32 %v1520_v56, %v1521_v59  ;;  %v705_v61 = vpop.f32.mrb[7].mxu0  ;;  %v786_v57 = vpop.f32.mrb[7].mxu1  ;;  %v3888_v2 = vmul.f32 0.0625, %v2996_v26  ;;  %v3896_v59 = vmul.f32 0.0625, %v3003_v29 }
 0x111   :  { %v1491_v23 = vrot.slane %v1490_v20, 1  ;;  %v1498_v3 = vrot.slane %v1497_v36, 2  ;;  %v1507_v22 = vrot.slane %v1506_v27, 2  ;;  %v1514_v35 = vrot.slane %v1513_v1, 4 }
 0x112   :  { %v3886_v21 = vmax.f32 %v1481_v60, %v1482_v48  ;;  %v1523_v58 = vrot.slane %v1522_v13, 4 }
 0x113   :  { %v3890_v28 = vmax.f32 %v1490_v20, %v1491_v23  ;;  %v1499_v62 = vmax.f32 %v1497_v36, %v1498_v3  ;;  %v1508_v38 = vmax.f32 %v1506_v27, %v1507_v22  ;;  %v1515_v12 = vmax.f32 %v1513_v1, %v1514_v35 }
 0x114   :  { %v1619_v32 = vsub.f32 %v3838_v55, %v3886_v21  ;;  %v1620_v39 = vsub.f32 %v3833_v34, %v3886_v21  ;;  %v3010_v3 = vpop.f32.mrb[8].mxu0  ;;  %v3017_v22 = vpop.f32.mrb[8].mxu1  ;;  %v1524_v55 = vmax.f32 %v1522_v13, %v1523_v58 }
 0x115   :  { %v1621_v60 = vsub.f32 %v3843_v47, %v3890_v28  ;;  %v1622_v48 = vsub.f32 %v3836_v42, %v3890_v28  ;;  %v1500_v20 = vrot.slane %v1499_v62, 1  ;;  %v1509_v56 = vrot.slane %v1508_v38, 1  ;;  %v867_v23 = vpop.f32.mrb[9].mxu0  ;;  %v948_v35 = vpop.f32.mrb[9].mxu1 }
 0x116   :  { %v1651_v36 = vmul.f32 1.442695, %v1619_v32  ;;  %v1653_v27 = vmul.f32 1.442695, %v1620_v39  ;;  %v1516_v26 = vrot.slane %v1515_v12, 2  ;;  %v1525_v33 = vrot.slane %v1524_v55, 2 }
 0x117   :  { %v1655_v53 = vmul.f32 1.442695, %v1621_v60  ;;  %v1657_v34 = vmul.f32 1.442695, %v1622_v48  ;;  %v3902_v1 = vmax.f32 %v1499_v62, %v1500_v20  ;;  %v3904_v29 = vmax.f32 %v1508_v38, %v1509_v56 }
 0x118   :  { %3202 = vpow2.f32 %v1651_v36  ;;  %v1517_v47 = vmax.f32 %v1515_v12, %v1516_v26  ;;  %v1530_v42 = vsel %vm146_vm0, %v3888_v2, -inf  ;;  %v1526_v12 = vmax.f32 %v1524_v55, %v1525_v33 }
 0x119   :  { %3204 = vpow2.f32 %v1653_v27  ;;  %v1623_v32 = vsub.f32 %v3857_v6, %v3902_v1  ;;  %v1624_v13 = vsub.f32 %v3852_v14, %v3902_v1  ;;  %v1625_v62 = vsub.f32 %v3859_v16, %v3904_v29  ;;  %v3024_v39 = vpop.f32.mrb[10].mxu0  ;;  %v3031_v60 = vpop.f32.mrb[10].mxu1 }
 0x11a   :  { %3206 = vpow2.f32 %v1655_v53  ;;  %v1626_v38 = vsub.f32 %v3854_v11, %v3904_v29  ;;  %v1518_v58 = vrot.slane %v1517_v47, 1  ;;  %v1539_v6 = vsel %vm146_vm0, %v3896_v59, -inf  ;;  %v1029_v53 = vpop.f32.mrb[11].mxu0  ;;  %v1110_v16 = vpop.f32.mrb[11].mxu1 }
 0x11b   :  { %3208 = vpow2.f32 %v1657_v34  ;;  %v1659_v48 = vmul.f32 1.442695, %v1623_v32  ;;  %v1661_v20 = vmul.f32 1.442695, %v1624_v13  ;;  %v1663_v56 = vmul.f32 1.442695, %v1625_v62 }
 0x11c   :  { %v3918_v36 = vmax.f32 %v1517_v47, %v1518_v58  ;;  %v1527_v14 = vrot.slane %v1526_v12, 1  ;;  %v3920_v27 = vmul.f32 0.0625, %v705_v61  ;;  %v1665_v11 = vmul.f32 1.442695, %v1626_v38 }
 0x11d   :  { %3210 = vpow2.f32 %v1659_v48  ;;  %v3922_v26 = vmul.f32 0.0625, %v786_v57  ;;  %v3924_v33 = vmul.f32 0.0625, %v3010_v3  ;;  %v3932_v47 = vmul.f32 0.0625, %v3017_v22 }
 0x11e   :  { %v1627_v55 = vsub.f32 %v3874_v4, %v3918_v36  ;;  %v1628_v34 = vsub.f32 %v3870_v54, %v3918_v36  ;;  %v3930_v32 = vmax.f32 %v1526_v12, %v1527_v14  ;;  %3212 = vpow2.f32 %v1661_v20  ;;  %v3038_v13 = vpop.f32.mrb[12].mxu0  ;;  %v3940_v62 = vpop.f32.mrb[12].mxu1 }
 0x11f   :  { %v1529_v61 = vsel %vm146_vm0, %v3920_v27, -inf  ;;  %v1538_v57 = vsel %vm146_vm0, %v3922_v26, -inf  ;;  %v1548_v3 = vsel %vm146_vm0, %v3924_v33, -inf  ;;  %3214 = vpow2.f32 %v1663_v56  ;;  %v1191_v38 = vpop.f32.mrb[13].mxu0  ;;  %v3944_v58 = vpop.f32.mrb[13].mxu1 }
 0x120   :  { %v1667_v4 = vmul.f32 1.442695, %v1627_v55  ;;  %v1669_v54 = vmul.f32 1.442695, %v1628_v34  ;;  %v1629_v22 = vsub.f32 %v3880_v15, %v3930_v32  ;;  %3216 = vpow2.f32 %v1665_v11 }
 0x121   :  { %v1630_v12 = vsub.f32 %v3872_v37, %v3930_v32  ;;  %v1531_v48 = vmax.f32 %v1529_v61, %v1530_v42  ;;  %v1540_v20 = vmax.f32 %v1538_v57, %v1539_v6  ;;  %v1557_v56 = vsel %vm146_vm0, %v3932_v47, -inf }
 0x122   :  { %v3948_v14 = vpop.eup %3202  ;;  %v1671_v19 = vmul.f32 1.442695, %v1629_v22  ;;  %v3952_v55 = vmul.f32 0.0625, %v867_v23  ;;  %v3954_v34 = vmul.f32 0.0625, %v948_v35  ;;  %3218 = vpow2.f32 %v1667_v4 }
 0x123   :  { %v3956_v15 = vpop.eup %3204  ;;  %v1673_v41 = vmul.f32 1.442695, %v1630_v12  ;;  %v1532_v11 = vrot.slane %v1531_v48, 4  ;;  %v1541_v52 = vrot.slane %v1540_v20, 4  ;;  %3220 = vpow2.f32 %v1669_v54  ;;  %v3966_v23 = vpop.f32.mrb[14].mxu0 }
 0x124   :  { %v3958_v18 = vpop.eup %3206  ;;  %v1547_v37 = vsel %vm146_vm0, %v3952_v55, -inf  ;;  %v1556_v42 = vsel %vm146_vm0, %v3954_v34, -inf  ;;  %v3964_v6 = vmul.f32 0.0625, %v3024_v39  ;;  %v3968_v35 = vpop.f32.mrb[14].mxu1  ;;  %3222 = vpow2.f32 %v1671_v19 }
 0x125   :  { %v3970_v61 = vpop.eup %3208  ;;  %v1533_v57 = vmax.f32 %v1531_v48, %v1532_v11  ;;  %v1542_v4 = vmax.f32 %v1540_v20, %v1541_v52  ;;  %v1549_v22 = vmax.f32 %v1547_v37, %v1548_v3  ;;  %v3972_v12 = vpop.f32.mrb[15].mxu0  ;;  %v1558_v17 = vmax.f32 %v1556_v42, %v1557_v56 }
 0x126   :  { %v3974_v54 = vpop.f32.mrb[15].mxu1  ;;  %v1566_v49 = vsel %vm146_vm0, %v3964_v6, -inf  ;;  %v3978_v39 = vmul.f32 0.0625, %v3031_v60  ;;  %v3980_v50 = vmul.f32 0.0625, %v1029_v53  ;;  %v3984_v48 = vmul.f32 0.0625, %v1110_v16 }
 0x127   :  { %v3982_v8 = vpop.eup %3210  ;;  %v1534_v46 = vrot.slane %v1533_v57, 2  ;;  %v1543_v10 = vrot.slane %v1542_v4, 2  ;;  %v1550_v19 = vrot.slane %v1549_v22, 4  ;;  %v1559_v52 = vrot.slane %v1558_v17, 4 }
 0x128   :  { %v1575_v3 = vsel %vm146_vm0, %v3978_v39, -inf  ;;  %v1565_v20 = vsel %vm146_vm0, %v3980_v50, -inf  ;;  %v3990_v56 = vmul.f32 0.0625, %v3038_v13  ;;  %v3992_v60 = vpop.eup %3212  ;;  %3224 = vpow2.f32 %v1673_v41 }
 0x129   :  { %v1535_v53 = vmax.f32 %v1533_v57, %v1534_v46  ;;  %v1544_v11 = vmax.f32 %v1542_v4, %v1543_v10  ;;  %v1551_v37 = vmax.f32 %v1549_v22, %v1550_v19  ;;  %v1567_v42 = vmax.f32 %v1565_v20, %v1566_v49  ;;  %v3994_v7 = vpop.eup %3214 }
 0x12a   :  { %v1560_v16 = vmax.f32 %v1558_v17, %v1559_v52  ;;  %v1574_v51 = vsel %vm146_vm0, %v3984_v48, -inf  ;;  %v1584_v24 = vsel %vm146_vm0, %v3990_v56, -inf  ;;  %v4000_v43 = vpop.eup %3216  ;;  %v4003_v49 = vmul.f32 0.0625, %v3940_v62 }
 0x12b   :  { %v1536_v13 = vrot.slane %v1535_v53, 1  ;;  %v1545_v0 = vrot.slane %v1544_v11, 1  ;;  %v1552_v5 = vrot.slane %v1551_v37, 2  ;;  %v1568_v63 = vrot.slane %v1567_v42, 4 }
 0x12c   :  { %v1561_v46 = vrot.slane %v1560_v16, 2  ;;  %v1576_v10 = vmax.f32 %v1574_v51, %v1575_v3  ;;  %v4005_v57 = vmul.f32 0.0625, %v1191_v38  ;;  %v4007_v17 = vpop.eup %3218  ;;  %v4018_v62 = vmul.f32 0.0625, %v3944_v58 }
 0x12d   :  { %v4009_v41 = vmax.f32 %v1535_v53, %v1536_v13  ;;  %v4011_v4 = vmax.f32 %v1544_v11, %v1545_v0  ;;  %v1553_v22 = vmax.f32 %v1551_v37, %v1552_v5  ;;  %v1569_v19 = vmax.f32 %v1567_v42, %v1568_v63  ;;  %v4013_v52 = vpop.eup %3220 }
 0x12e   :  { %v1562_v20 = vmax.f32 %v1560_v16, %v1561_v46  ;;  %v1577_v9 = vrot.slane %v1576_v10, 4  ;;  %v1583_v51 = vsel %vm146_vm0, %v4005_v57, -inf  ;;  %v4020_v38 = vpop.eup %3222  ;;  %v1593_v13 = vsel %vm146_vm0, %v4003_v49, -inf }
 0x12f   :  { %v1631_v3 = vsub.f32 %v3920_v27, %v4009_v41  ;;  %v1632_v0 = vsub.f32 %v3888_v2, %v4009_v41  ;;  %v1633_v5 = vsub.f32 %v3922_v26, %v4011_v4  ;;  %v1634_v63 = vsub.f32 %v3896_v59, %v4011_v4 }
 0x130   :  { %v1554_v53 = vrot.slane %v1553_v22, 1  ;;  %v1563_v11 = vrot.slane %v1562_v20, 1  ;;  %v1570_v37 = vrot.slane %v1569_v19, 2  ;;  %v1578_v42 = vmax.f32 %v1576_v10, %v1577_v9 }
 0x131   :  { %v1675_v58 = vmul.f32 1.442695, %v1631_v3  ;;  %v1677_v16 = vmul.f32 1.442695, %v1632_v0  ;;  %v1585_v46 = vmax.f32 %v1583_v51, %v1584_v24  ;;  %v1679_v27 = vmul.f32 1.442695, %v1633_v5 }
 0x132   :  { %v4032_v44 = vmax.f32 %v1553_v22, %v1554_v53  ;;  %v4034_v2 = vmax.f32 %v1562_v20, %v1563_v11  ;;  %v1571_v45 = vmax.f32 %v1569_v19, %v1570_v37  ;;  %v1681_v26 = vmul.f32 1.442695, %v1634_v63  ;;  %v4036_v30 = vpop.eup %3224 }
 0x133   :  { %3226 = vpow2.f32 %v1675_v58  ;;  %v1579_v31 = vrot.slane %v1578_v42, 2  ;;  %v1586_v59 = vrot.slane %v1585_v46, 4  ;;  %v1592_v22 = vsel %vm146_vm0, %v4018_v62, -inf }
 0x134   :  { %v1635_v9 = vsub.f32 %v3952_v55, %v4032_v44  ;;  %v1636_v10 = vsub.f32 %v3924_v33, %v4032_v44  ;;  %v1637_v24 = vsub.f32 %v3954_v34, %v4034_v2  ;;  %3228 = vpow2.f32 %v1677_v16 }
 0x135   :  { %v1638_v19 = vsub.f32 %v3932_v47, %v4034_v2  ;;  %v1572_v20 = vrot.slane %v1571_v45, 1  ;;  %v1580_v51 = vmax.f32 %v1578_v42, %v1579_v31  ;;  %3230 = vpow2.f32 %v1679_v27 }
 0x136   :  { %v1683_v3 = vmul.f32 1.442695, %v1635_v9  ;;  %v1587_v5 = vmax.f32 %v1585_v46, %v1586_v59  ;;  %3232 = vpow2.f32 %v1681_v26  ;;  %v1685_v33 = vmul.f32 1.442695, %v1636_v10 }
 0x137   :  { %v4048_v0 = vmax.f32 %v1571_v45, %v1572_v20  ;;  %v1581_v55 = vrot.slane %v1580_v51, 1  ;;  %v1687_v63 = vmul.f32 1.442695, %v1637_v24  ;;  %v1594_v53 = vmax.f32 %v1592_v22, %v1593_v13 }
 0x138   :  { %v4057_v31 = vmul.f32 0.0625, %v3966_v23  ;;  %v1689_v47 = vmul.f32 1.442695, %v1638_v19  ;;  %v1588_v45 = vrot.slane %v1587_v5, 2  ;;  %v4060_v58 = vmul.f32 0.0625, %v3968_v35 }
 0x139   :  { %v1639_v34 = vsub.f32 %v3980_v50, %v4048_v0  ;;  %v1640_v11 = vsub.f32 %v3964_v6, %v4048_v0  ;;  %v4054_v37 = vmax.f32 %v1580_v51, %v1581_v55  ;;  %v1595_v42 = vrot.slane %v1594_v53, 4 }
 0x13a   :  { %3234 = vpow2.f32 %v1683_v3  ;;  %v1589_v6 = vmax.f32 %v1587_v5, %v1588_v45  ;;  %v1602_v23 = vsel %vm146_vm0, %v4057_v31, -inf  ;;  %v4071_v27 = vmul.f32 0.0625, %v3972_v12 }
 0x13b   :  { %v1641_v16 = vsub.f32 %v3984_v48, %v4054_v37  ;;  %3236 = vpow2.f32 %v1685_v33  ;;  %v1642_v50 = vsub.f32 %v3978_v39, %v4054_v37  ;;  %v1596_v13 = vmax.f32 %v1594_v53, %v1595_v42 }
 0x13c   :  { %3238 = vpow2.f32 %v1687_v63  ;;  %v4074_v35 = vmul.f32 0.0625, %v3974_v54  ;;  %v1590_v48 = vrot.slane %v1589_v6, 1  ;;  %v1611_v39 = vsel %vm146_vm0, %v4060_v58, -inf }
 0x13d   :  { %v4066_v46 = vpop.eup %3226  ;;  %3240 = vpow2.f32 %v1689_v47  ;;  %v1597_v26 = vrot.slane %v1596_v13, 2  ;;  %v1691_v9 = vmul.f32 1.442695, %v1639_v34  ;;  %v1693_v10 = vmul.f32 1.442695, %v1640_v11 }
 0x13e   :  { %v4078_v59 = vpop.eup %3228  ;;  %v1601_v24 = vsel %vm146_vm0, %v4071_v27, -inf  ;;  %v1610_v12 = vsel %vm146_vm0, %v4074_v35, -inf  ;;  %v4086_v54 = vmax.f32 %v1589_v6, %v1590_v48  ;;  %v1715_v51 = vsel %vm146_vm0, %v3948_v14, 0.0 }
 0x13f   :  { %v4084_v22 = vpop.eup %3230  ;;  %v1598_v19 = vmax.f32 %v1596_v13, %v1597_v26  ;;  %v1603_v20 = vmax.f32 %v1601_v24, %v1602_v23  ;;  %v1612_v3 = vmax.f32 %v1610_v12, %v1611_v39  ;;  %v1716_v55 = vsel %vm146_vm0, %v3956_v15, 0.0 }
 0x140   :  { %v1724_v5 = vsel %vm146_vm0, %v3958_v18, 0.0  ;;  %v1725_v33 = vsel %vm146_vm0, %v3970_v61, 0.0  ;;  %v4096_v63 = vpop.eup %3232  ;;  %v1643_v53 = vsub.f32 %v4005_v57, %v4086_v54  ;;  %v1644_v34 = vsub.f32 %v3990_v56, %v4086_v54 }
 0x141   :  { %v1599_v11 = vrot.slane %v1598_v19, 1  ;;  %v1604_v14 = vrot.slane %v1603_v20, 4  ;;  %3242 = vpow2.f32 %v1691_v9  ;;  %v1613_v47 = vrot.slane %v1612_v3, 4 }
 0x142   :  { %v1717_v45 = vadd.f32 %v1716_v55, %v1715_v51  ;;  %v1726_v15 = vadd.f32 %v1725_v33, %v1724_v5  ;;  %v1695_v42 = vmul.f32 1.442695, %v1641_v16  ;;  %v1733_v61 = vsel %vm146_vm0, %v3982_v8, 0.0 }
 0x143   :  { %v4102_v6 = vmax.f32 %v1598_v19, %v1599_v11  ;;  %v1605_v18 = vmax.f32 %v1603_v20, %v1604_v14  ;;  %v1614_v23 = vmax.f32 %v1612_v3, %v1613_v47  ;;  %v1734_v56 = vsel %vm146_vm0, %v3992_v60, 0.0 }
 0x144   :  { %v4106_v13 = vpop.eup %3234  ;;  %v1718_v57 = vrot.slane %v1717_v45, 4  ;;  %v1727_v48 = vrot.slane %v1726_v15, 4  ;;  %v1697_v39 = vmul.f32 1.442695, %v1642_v50  ;;  %3244 = vpow2.f32 %v1693_v10 }
 0x145   :  { %v4110_v26 = vpop.eup %3236  ;;  %v1645_v16 = vsub.f32 %v4018_v62, %v4102_v6  ;;  %v1646_v9 = vsub.f32 %v4003_v49, %v4102_v6  ;;  %v1606_v24 = vrot.slane %v1605_v18, 2  ;;  %v1615_v8 = vrot.slane %v1614_v23, 2 }
 0x146   :  { %v4116_v12 = vpop.eup %3238  ;;  %v1719_v19 = vadd.f32 %v1718_v57, %v1717_v45  ;;  %v1728_v20 = vadd.f32 %v1727_v48, %v1726_v15  ;;  %3246 = vpow2.f32 %v1695_v42  ;;  %v1735_v3 = vadd.f32 %v1734_v56, %v1733_v61 }
 0x147   :  { %v4118_v51 = vpop.eup %3240  ;;  %v1607_v60 = vmax.f32 %v1605_v18, %v1606_v24  ;;  %v1616_v55 = vmax.f32 %v1614_v23, %v1615_v8  ;;  %v1742_v62 = vsel %vm146_vm0, %v3994_v7, 0.0  ;;  %3248 = vpow2.f32 %v1697_v39 }
 0x148   :  { %v1720_v50 = vrot.slane %v1719_v19, 2  ;;  %v1729_v5 = vrot.slane %v1728_v20, 2  ;;  %v1736_v33 = vrot.slane %v1735_v3, 4  ;;  %v1743_v10 = vsel %vm146_vm0, %v4000_v43, 0.0 }
 0x149   :  { %v1608_v49 = vrot.slane %v1607_v60, 1  ;;  %v1699_v11 = vmul.f32 1.442695, %v1643_v53  ;;  %v1617_v14 = vrot.slane %v1616_v55, 1  ;;  %v1744_v18 = vadd.f32 %v1743_v10, %v1742_v62 }
 0x14a   :  { %v1721_v47 = vadd.f32 %v1720_v50, %v1719_v19  ;;  %v1730_v45 = vadd.f32 %v1729_v5, %v1728_v20  ;;  %v1737_v42 = vadd.f32 %v1736_v33, %v1735_v3  ;;  %v1751_v61 = vsel %vm146_vm0, %v4007_v17, 0.0 }
 0x14b   :  { %v4124_v15 = vmax.f32 %v1607_v60, %v1608_v49  ;;  %v4128_v23 = vpop.eup %3242  ;;  %v4130_v7 = vmax.f32 %v1616_v55, %v1617_v14  ;;  %v1752_v43 = vsel %vm146_vm0, %v4013_v52, 0.0  ;;  %v1745_v24 = vrot.slane %v1744_v18, 4 }
 0x14c   :  { %v1722_v57 = vrot.slane %v1721_v47, 1  ;;  %v1731_v48 = vrot.slane %v1730_v45, 1  ;;  %v1738_v39 = vrot.slane %v1737_v42, 2  ;;  %v1701_v8 = vmul.f32 1.442695, %v1644_v34 }
 0x14d   :  { %v1647_v53 = vsub.f32 %v4071_v27, %v4124_v15  ;;  %v1648_v56 = vsub.f32 %v4057_v31, %v4124_v15  ;;  %v1649_v17 = vsub.f32 %v4074_v35, %v4130_v7  ;;  %v1650_v19 = vsub.f32 %v4060_v58, %v4130_v7 }
 0x14e   :  { %v1723_v20 = vadd.f32 %v1722_v57, %v1721_v47  ;;  %3250 = vpow2.f32 %v1699_v11  ;;  %v1739_v60 = vadd.f32 %v1738_v39, %v1737_v42  ;;  %v1746_v3 = vadd.f32 %v1745_v24, %v1744_v18  ;;  %v4142_v52 = vpop.eup %3244 }
 0x14f   :  { %v1703_v55 = vmul.f32 1.442695, %v1645_v16  ;;  %v1753_v27 = vadd.f32 %v1752_v43, %v1751_v61  ;;  %v1732_v31 = vadd.f32 %v1731_v48, %v1730_v45  ;;  %v1760_v35 = vsel %vm146_vm0, %v4020_v38, 0.0 }
 0x150   :  { %3252 = vlog2.f32 %v1723_v20  ;;  %v4144_v50 = vpop.eup %3246  ;;  %v1740_v5 = vrot.slane %v1739_v60, 1  ;;  %v1747_v34 = vrot.slane %v1746_v3, 2  ;;  %v1761_v58 = vsel %vm146_vm0, %v4036_v30, 0.0 }
 0x151   :  { %3254 = vpow2.f32 %v1701_v8  ;;  %v1754_v62 = vrot.slane %v1753_v27, 4  ;;  %v1769_v49 = vsel %vm146_vm0, %v4066_v46, 0.0  ;;  %v4152_v33 = vpop.eup %3248  ;;  %v1705_v16 = vmul.f32 1.442695, %v1646_v9 }
 0x152   :  { %v1741_v10 = vadd.f32 %v1740_v5, %v1739_v60  ;;  %v1748_v11 = vadd.f32 %v1747_v34, %v1746_v3  ;;  %v1762_v14 = vadd.f32 %v1761_v58, %v1760_v35  ;;  %3256 = vpow2.f32 %v1703_v55 }
 0x153   :  { %v1755_v47 = vadd.f32 %v1754_v62, %v1753_v27  ;;  %v1770_v45 = vsel %vm146_vm0, %v4078_v59, 0.0  ;;  %v1778_v38 = vsel %vm146_vm0, %v4084_v22, 0.0  ;;  %3258 = vlog2.f32 %v1732_v31 }
 0x154   :  { %v1749_v42 = vrot.slane %v1748_v11, 1  ;;  %v1763_v30 = vrot.slane %v1762_v14, 4  ;;  %v1771_v18 = vadd.f32 %v1770_v45, %v1769_v49  ;;  %3260 = vlog2.f32 %v1741_v10 }
 0x155   :  { %v1756_v46 = vrot.slane %v1755_v47, 2  ;;  %v1779_v9 = vsel %vm146_vm0, %v4096_v63, 0.0  ;;  %v1787_v61 = vsel %vm146_vm0, %v4106_v13, 0.0  ;;  %3262 = vpow2.f32 %v1705_v16 }
 0x156   :  { %v1750_v57 = vadd.f32 %v1749_v42, %v1748_v11  ;;  %v1764_v48 = vadd.f32 %v1763_v30, %v1762_v14  ;;  %v1772_v43 = vrot.slane %v1771_v18, 4  ;;  %v1707_v59 = vmul.f32 1.442695, %v1647_v53 }
 0x157   :  { %v1757_v39 = vadd.f32 %v1756_v46, %v1755_v47  ;;  %v1780_v24 = vadd.f32 %v1779_v9, %v1778_v38  ;;  %v1788_v22 = vsel %vm146_vm0, %v4110_v26, 0.0  ;;  %v1709_v55 = vmul.f32 1.442695, %v1648_v56 }
 0x158   :  { %v4164_v8 = vpop.eup %3250  ;;  %3264 = vlog2.f32 %v1750_v57  ;;  %v1765_v20 = vrot.slane %v1764_v48, 2  ;;  %v1773_v60 = vadd.f32 %v1772_v43, %v1771_v18  ;;  %v1789_v3 = vadd.f32 %v1788_v22, %v1787_v61 }
 0x159   :  { %v1758_v27 = vrot.slane %v1757_v39, 1  ;;  %v1781_v13 = vrot.slane %v1780_v24, 4  ;;  %v1796_v31 = vsel %vm146_vm0, %v4116_v12, 0.0  ;;  %v1711_v58 = vmul.f32 1.442695, %v1649_v17 }
 0x15a   :  { %v3253_v63 = vpop.eup %3252  ;;  %v1766_v53 = vadd.f32 %v1765_v20, %v1764_v48  ;;  %v1774_v34 = vrot.slane %v1773_v60, 2  ;;  %v1790_v35 = vrot.slane %v1789_v3, 4  ;;  %v1797_v16 = vsel %vm146_vm0, %v4118_v51, 0.0 }
 0x15b   :  { %v1860_v5 = vmul.f32 0.6931472, %v3253_v63  ;;  %v3255_v62 = vpop.eup %3254  ;;  %v1759_v26 = vadd.f32 %v1758_v27, %v1757_v39  ;;  %v1782_v49 = vadd.f32 %v1781_v13, %v1780_v24  ;;  %v1713_v10 = vmul.f32 1.442695, %v1650_v19 }
 0x15c   :  { %v1767_v56 = vrot.slane %v1766_v53, 1  ;;  %v1775_v14 = vadd.f32 %v1774_v34, %v1773_v60  ;;  %v3257_v47 = vpop.eup %3256  ;;  %v1791_v12 = vadd.f32 %v1790_v35, %v1789_v3  ;;  %v1798_v38 = vadd.f32 %v1797_v16, %v1796_v31 }
 0x15d   :  { %v1891_v11 = vadd.f32 %v1860_v5, %v3886_v21  ;;  %3266 = vlog2.f32 %v1759_v26  ;;  %v1783_v45 = vrot.slane %v1782_v49, 2  ;;  %v3259_v42 = vpop.eup %3258  ;;  %v1805_v18 = vsel %vm146_vm0, %v4128_v23, 0.0 }
 0x15e   :  { %3268 = vpow2.f32 %v1707_v59  ;;  %v1768_v17 = vadd.f32 %v1767_v56, %v1766_v53  ;;  %v1776_v30 = vrot.slane %v1775_v14, 1  ;;  %v3261_v51 = vpop.eup %3260  ;;  %v1862_v19 = vmul.f32 0.6931472, %v3259_v42 }
 0x15f   :  { %2312 = vbcast.lane.b32.xlu1 %v1891_v11, 264  ;;  %2308 = vbcast.lane.b32.xlu0 %v1891_v11, 256  ;;  %v1784_v46 = vadd.f32 %v1783_v45, %v1782_v49  ;;  %v1792_v21 = vrot.slane %v1791_v12, 2  ;;  %v1806_v9 = vsel %vm146_vm0, %v4142_v52, 0.0  ;;  %v3263_v61 = vpop.eup %3262  ;;  %v1864_v57 = vmul.f32 0.6931472, %v3261_v51 }
 0x160   :  { %3270 = vlog2.f32 %v1768_v17  ;;  %v1777_v48 = vadd.f32 %v1776_v30, %v1775_v14  ;;  %v1799_v43 = vrot.slane %v1798_v38, 4  ;;  %v1892_v59 = vadd.f32 %v1862_v19, %v3890_v28 }
 0x161   :  { %3272 = vpow2.f32 %v1709_v55  ;;  %v1785_v39 = vrot.slane %v1784_v46, 1  ;;  %v1793_v24 = vadd.f32 %v1792_v21, %v1791_v12  ;;  %v1893_v23 = vadd.f32 %v1864_v57, %v3902_v1 }
 0x162   :  { %v3265_v22 = vpop.eup %3264  ;;  %3274 = vlog2.f32 %v1777_v48  ;;  %v1800_v20 = vadd.f32 %v1799_v43, %v1798_v38  ;;  %v1807_v60 = vadd.f32 %v1806_v9, %v1805_v18  ;;  %v1814_v27 = vsel %vm146_vm0, %v4144_v50, 0.0 }
 0x163   :  { %2315 = vbcast.lane.b32.xlu1 %v1892_v59, 256  ;;  %v1866_v3 = vmul.f32 0.6931472, %v3265_v22  ;;  %v1786_v63 = vadd.f32 %v1785_v39, %v1784_v46  ;;  %v1794_v52 = vrot.slane %v1793_v24, 1  ;;  %3276 = vpow2.f32 %v1711_v58  ;;  %2322 = vbcast.lane.b32.xlu0 %v1893_v23, 256 }
 0x164   :  { %v1801_v55 = vrot.slane %v1800_v20, 2  ;;  %v1808_v13 = vrot.slane %v1807_v60, 4  ;;  %v1815_v1 = vsel %vm146_vm0, %v4152_v33, 0.0  ;;  %v1823_v50 = vsel %vm146_vm0, %v4164_v8, 0.0 }
 0x165   :  { %v1894_v28 = vadd.f32 %v1866_v3, %v3904_v29  ;;  %3278 = vlog2.f32 %v1786_v63  ;;  %v1795_v31 = vadd.f32 %v1794_v52, %v1793_v24  ;;  %v1816_v34 = vadd.f32 %v1815_v1, %v1814_v27  ;;  %v4193_v63 = vpop.xlane.xlu0 %2100  ;;  %v4195_v52 = vpop.xlane.xlu1 %2103 }
 0x166   :  { %3280 = vpow2.f32 %v1713_v10  ;;  %v1802_v5 = vadd.f32 %v1801_v55, %v1800_v20  ;;  %v1809_v53 = vadd.f32 %v1808_v13, %v1807_v60  ;;  %v1824_v58 = vsel %vm146_vm0, %v3255_v62, 0.0 }
 0x167   :  { %v3267_v35 = vpop.eup %3266  ;;  %2319 = vbcast.lane.b32.xlu1 %v1892_v59, 264  ;;  %3282 = vlog2.f32 %v1795_v31  ;;  %2329 = vbcast.lane.b32.xlu0 %v1894_v28, 256  ;;  %v1817_v11 = vrot.slane %v1816_v34, 4  ;;  %v1825_v56 = vadd.f32 %v1824_v58, %v1823_v50  ;;  %v1832_v33 = vsel %vm146_vm0, %v3257_v47, 0.0 }
 0x168   :  { %v3269_v26 = vpop.eup %3268  ;;  %v1868_v29 = vmul.f32 0.6931472, %v3267_v35  ;;  %v1803_v49 = vrot.slane %v1802_v5, 1  ;;  %v1810_v16 = vrot.slane %v1809_v53, 2  ;;  %v1833_v10 = vsel %vm146_vm0, %v3263_v61, 0.0 }
 0x169   :  { %v1818_v62 = vadd.f32 %v1817_v11, %v1816_v34  ;;  %v1826_v17 = vrot.slane %v1825_v56, 4  ;;  %v1834_v51 = vadd.f32 %v1833_v10, %v1832_v33  ;;  %v1841_v59 = vsel %vm146_vm0, %v3269_v26, 0.0  ;;  %v4200_v11 = vpop.xlane.xlu0 %2106 }
 0x16a   :  { %v3271_v14 = vpop.eup %3270  ;;  %v1895_v45 = vadd.f32 %v1868_v29, %v3918_v36  ;;  %v1804_v12 = vadd.f32 %v1803_v49, %v1802_v5  ;;  %v1811_v38 = vadd.f32 %v1810_v16, %v1809_v53  ;;  %v3430_v10 = vmov 0  }
 0x16b   :  { %v3273_v42 = vpop.eup %3272  ;;  %2326 = vbcast.lane.b32.xlu1 %v1893_v23, 264  ;;  %v1870_v8 = vmul.f32 0.6931472, %v3271_v14  ;;  %v1819_v46 = vrot.slane %v1818_v62, 2  ;;  %v1827_v21 = vadd.f32 %v1826_v17, %v1825_v56  ;;  %v1835_v36 = vrot.slane %v1834_v51, 4  ;;  %v4202_v56 = vpop.xlane.xlu1 %2109  ;;  %3136 = vset.pattern.permute.xlu0 %v3430_v10 }
 0x16c   :  { %v3275_v30 = vpop.eup %3274  ;;  %2336 = vbcast.lane.b32.xlu0 %v1895_v45, 256  ;;  %3284 = vlog2.f32 %v1804_v12  ;;  %v1812_v18 = vrot.slane %v1811_v38, 1  ;;  %v1842_v60 = vsel %vm146_vm0, %v3273_v42, 0.0  ;;  %3137 = vset.pattern.permute.xlu1 %v3430_v10 }
 0x16d   :  { %v1896_v19 = vadd.f32 %v1870_v8, %v3930_v32  ;;  %v1872_v47 = vmul.f32 0.6931472, %v3275_v30  ;;  %v3277_v9 = vpop.eup %3276  ;;  %v1820_v43 = vadd.f32 %v1819_v46, %v1818_v62  ;;  %v1828_v22 = vrot.slane %v1827_v21, 2  ;;  %v4206_v17 = vpop.xlane.xlu0 %2148 }
 0x16e   :  { %v1813_v61 = vadd.f32 %v1812_v18, %v1811_v38  ;;  %v1836_v23 = vadd.f32 %v1835_v36, %v1834_v51  ;;  %v1850_v3 = vsel %vm146_vm0, %v3277_v9, 0.0  ;;  %v1843_v31 = vadd.f32 %v1842_v60, %v1841_v59 }
 0x16f   :  { %v3279_v57 = vpop.eup %3278  ;;  %2333 = vbcast.lane.b32.xlu1 %v1894_v28, 264  ;;  %v1897_v48 = vadd.f32 %v1872_v47, %v4009_v41  ;;  %v1821_v20 = vrot.slane %v1820_v43, 1  ;;  %v1829_v55 = vadd.f32 %v1828_v22, %v1827_v21  ;;  %v4208_v30 = vpop.xlane.xlu1 %2151 }
 0x170   :  { %v3281_v39 = vpop.eup %3280  ;;  %2343 = vbcast.lane.b32.xlu0 %v1896_v19, 256  ;;  %v1874_v24 = vmul.f32 0.6931472, %v3279_v57  ;;  %3286 = vlog2.f32 %v1813_v61  ;;  %v1837_v13 = vrot.slane %v1836_v23, 2  ;;  %v1844_v35 = vrot.slane %v1843_v31, 4 }
 0x171   :  { %v3283_v32 = vpop.eup %3282  ;;  %v1822_v28 = vadd.f32 %v1821_v20, %v1820_v43  ;;  %v1851_v1 = vsel %vm146_vm0, %v3281_v39, 0.0  ;;  %v1830_v53 = vrot.slane %v1829_v55, 1 }
 0x172   :  { %v1898_v41 = vadd.f32 %v1874_v24, %v4011_v4  ;;  %v1876_v27 = vmul.f32 0.6931472, %v3283_v32  ;;  %v1838_v34 = vadd.f32 %v1837_v13, %v1836_v23  ;;  %v1852_v50 = vadd.f32 %v1851_v1, %v1850_v3 }
 0x173   :  { %2340 = vbcast.lane.b32.xlu1 %v1895_v45, 264  ;;  %3288 = vlog2.f32 %v1822_v28  ;;  %v1831_v26 = vadd.f32 %v1830_v53, %v1829_v55  ;;  %v1845_v49 = vadd.f32 %v1844_v35, %v1843_v31  ;;  %v4213_v57 = vpop.xlane.xlu1 %2157 }
 0x174   :  { %2350 = vbcast.lane.b32.xlu0 %v1897_v48, 256  ;;  %v1899_v5 = vadd.f32 %v1876_v27, %v4032_v44  ;;  %v1839_v29 = vrot.slane %v1838_v34, 1  ;;  %v1853_v16 = vrot.slane %v1852_v50, 4 }
 0x175   :  { %3290 = vlog2.f32 %v1831_v26  ;;  %v1846_v45 = vrot.slane %v1845_v49, 2 }
 0x176   :  { %v3285_v58 = vpop.eup %3284  ;;  %v1840_v33 = vadd.f32 %v1839_v29, %v1838_v34  ;;  %v1854_v12 = vadd.f32 %v1853_v16, %v1852_v50 }
 0x177   :  { %2347 = vbcast.lane.b32.xlu1 %v1896_v19, 264  ;;  %v1878_v4 = vmul.f32 0.6931472, %v3285_v58  ;;  %v1847_v42 = vadd.f32 %v1846_v45, %v1845_v49 }
 0x178   :  { %2357 = vbcast.lane.b32.xlu0 %v1898_v41, 256  ;;  %3292 = vlog2.f32 %v1840_v33  ;;  %v1855_v8 = vrot.slane %v1854_v12, 2 }
 0x179   :  { %v1900_v44 = vadd.f32 %v1878_v4, %v4034_v2  ;;  %v1848_v2 = vrot.slane %v1847_v42, 1 }
 0x17a   :  { %v3287_v14 = vpop.eup %3286  ;;  %v1856_v18 = vadd.f32 %v1855_v8, %v1854_v12 }
 0x17b   :  { %2354 = vbcast.lane.b32.xlu1 %v1897_v48, 264  ;;  %v1880_v38 = vmul.f32 0.6931472, %v3287_v14  ;;  %v1849_v47 = vadd.f32 %v1848_v2, %v1847_v42 }
 0x17c   :  { %2364 = vbcast.lane.b32.xlu0 %v1899_v5, 256  ;;  %v1857_v46 = vrot.slane %v1856_v18, 1 }
 0x17d   :  { %v1901_v62 = vadd.f32 %v1880_v38, %v4048_v0  ;;  %v3289_v51 = vpop.eup %3288  ;;  %3294 = vlog2.f32 %v1849_v47  ;;  %v4211_v0 = vpop.xlane.xlu0 %2154 }
 0x17e   :  { %v1882_v19 = vmul.f32 0.6931472, %v3289_v51  ;;  %v1858_v61 = vadd.f32 %v1857_v46, %v1856_v18  ;;  %v4527_v51 = vld [vmem:[#allocation11_spill] sm:$0xff] }
 0x17f   :  { %2361 = vbcast.lane.b32.xlu1 %v1898_v41, 264  ;;  %v3291_v21 = vpop.eup %3290 }
 0x180   :  { %2371 = vbcast.lane.b32.xlu0 %v1900_v44, 256  ;;  %v1902_v9 = vadd.f32 %v1882_v19, %v4054_v37  ;;  %v1884_v36 = vmul.f32 0.6931472, %v3291_v21  ;;  %3296 = vlog2.f32 %v1858_v61  ;;  %v2116_v37 = vpop.xlane.xlu1 %2115 }
 0x181   :  { %v2113_v24 = vpop.xlane.xlu0 %2112  ;;  %3298 = vlog2.f32 %v4193_v63 }
 0x182   :  { %v3293_v48 = vpop.eup %3292  ;;  %v1903_v43 = vadd.f32 %v1884_v36, %v4086_v54  ;;  %3300 = vlog2.f32 %v4195_v52 }
 0x183   :  { %2368 = vbcast.lane.b32.xlu1 %v1899_v5, 264  ;;  %v1886_v59 = vmul.f32 0.6931472, %v3293_v48  ;;  %3302 = vlog2.f32 %v4200_v11  ;;  %v4528_v48 = vld [vmem:[#allocation17_spill] sm:$0xff] }
 0x184   :  { %2378 = vbcast.lane.b32.xlu0 %v1901_v62, 256  ;;  %v4220_v41 = vpop.xlane.xlu1 %2163  ;;  %3304 = vlog2.f32 %v4202_v56 }
 0x185   :  { %v1904_v39 = vadd.f32 %v1886_v59, %v4102_v6  ;;  %v4218_v3 = vpop.xlane.xlu0 %2160  ;;  %3306 = vlog2.f32 %v2113_v24  ;;  %v4529_v59 = vld [vmem:[#allocation12_spill] sm:$0xff] }
 0x186   :  { %3308 = vlog2.f32 %v2116_v37 }
 0x187   :  { %2375 = vbcast.lane.b32.xlu1 %v1900_v44, 264  ;;  %v3295_v22 = vpop.eup %3294 }
 0x188   :  { %2385 = vbcast.lane.b32.xlu0 %v1902_v9, 256  ;;  %v1888_v23 = vmul.f32 0.6931472, %v3295_v22  ;;  %v2122_v27 = vpop.xlane.xlu1 %2121 }
 0x189   :  { %v2119_v6 = vpop.xlane.xlu0 %2118 }
 0x18a   :  { %v3297_v32 = vpop.eup %3296  ;;  %v1905_v20 = vadd.f32 %v1888_v23, %v4124_v15  ;;  %3310 = vlog2.f32 %v2119_v6  ;;  %v4530_v6 = vld [vmem:[#allocation21_spill] sm:$0xff] }
 0x18b   :  { %2382 = vbcast.lane.b32.xlu1 %v1901_v62, 264  ;;  %v1890_v60 = vmul.f32 0.6931472, %v3297_v32  ;;  %v3299_v49 = vpop.eup %3298  ;;  %3312 = vlog2.f32 %v2122_v27 }
 0x18c   :  { %2392 = vbcast.lane.b32.xlu0 %v1903_v43, 256  ;;  %v4225_v13 = vpop.xlane.xlu1 %2169  ;;  %v3301_v16 = vpop.eup %3300  ;;  %v2196_v33 = vmul.f32 0.6931472, %v3299_v49 }
 0x18d   :  { %v1906_v54 = vadd.f32 %v1890_v60, %v4130_v7  ;;  %v4223_v55 = vpop.xlane.xlu0 %2166  ;;  %v2198_v44 = vmul.f32 0.6931472, %v3301_v16  ;;  %v3303_v10 = vpop.eup %3302 }
 0x18e   :  { %v2259_v56 = vadd.f32 %v2196_v33, %v3678_v25  ;;  %v3305_v14 = vpop.eup %3304  ;;  %v2200_v45 = vmul.f32 0.6931472, %v3303_v10  ;;  %v4532_v33 = vld [vmem:[#allocation25_spill] sm:$0xff] }
 0x18f   :  { %2389 = vbcast.lane.b32.xlu1 %v1902_v9, 264  ;;  %v2260_v11 = vadd.f32 %v2198_v44, %v3686_v40  ;;  %v3307_v42 = vpop.eup %3306  ;;  %v2202_v47 = vmul.f32 0.6931472, %v3305_v14 }
 0x190   :  { %2399 = vbcast.lane.b32.xlu0 %v1904_v39, 256  ;;  %v2128_v28 = vpop.xlane.xlu1 %2127  ;;  %v3309_v2 = vpop.eup %3308  ;;  %v2204_v18 = vmul.f32 0.6931472, %v3307_v42  ;;  %v2261_v19 = vadd.f32 %v2200_v45, %v4527_v51 }
 0x191   :  { %v2125_v15 = vpop.xlane.xlu0 %2124  ;;  %v2206_v61 = vmul.f32 0.6931472, %v3309_v2 }
 0x192   :  { %3314 = vlog2.f32 %v2125_v15  ;;  %v4531_v15 = vld [vmem:[#allocation18_spill] sm:$0xff] }
 0x193   :  { %2396 = vbcast.lane.b32.xlu1 %v1903_v43, 264  ;;  %3316 = vlog2.f32 %v2128_v28  ;;  %v2263_v43 = vadd.f32 %v2204_v18, %v4528_v48  ;;  %v2264_v28 = vadd.f32 %v2206_v61, %v4531_v15  ;;  %v4535_v18 = vld [vmem:[#allocation26_spill] sm:$0xff] }
 0x194   :  { %2406 = vbcast.lane.b32.xlu0 %v1905_v20, 256  ;;  %v4229_v1 = vpop.xlane.xlu1 %2175  ;;  %v3311_v46 = vpop.eup %3310 }
 0x195   :  { %v4227_v31 = vpop.xlane.xlu0 %2172  ;;  %v3313_v9 = vpop.eup %3312  ;;  %v2208_v36 = vmul.f32 0.6931472, %v3311_v46 }
 0x196   :  { %v2210_v60 = vmul.f32 0.6931472, %v3313_v9  ;;  %v4536_v9 = vld [vmem:[#allocation33_spill] sm:$0xff] }
 0x197   :  { %2403 = vbcast.lane.b32.xlu1 %v1904_v39, 264  ;;  %v2262_v39 = vadd.f32 %v2202_v47, %v4529_v59  ;;  %v2265_v27 = vadd.f32 %v2208_v36, %v4530_v6  ;;  %v4537_v36 = vld [vmem:[#allocation30_spill] sm:$0xff] }
 0x198   :  { %2413 = vbcast.lane.b32.xlu0 %v1906_v54, 256  ;;  %v2134_v7 = vpop.xlane.xlu1 %2133 }
 0x199   :  { %v2131_v5 = vpop.xlane.xlu0 %2130 }
 0x19a   :  { %3318 = vlog2.f32 %v2131_v5 }
 0x19b   :  { %2410 = vbcast.lane.b32.xlu1 %v1905_v20, 264  ;;  %3320 = vlog2.f32 %v2134_v7 }
 0x19c   :  { %v4233_v34 = vpop.xlane.xlu1 %2181  ;;  %v3315_v24 = vpop.eup %3314 }
 0x19d   :  { %v4231_v53 = vpop.xlane.xlu0 %2178  ;;  %v3317_v20 = vpop.eup %3316 }
 0x19e   :  { %v2214_v44 = vmul.f32 0.6931472, %v3317_v20  ;;  %v4539_v20 = vld [vmem:[#allocation34_spill] sm:$0xff] }
 0x19f   :  { %2417 = vbcast.lane.b32.xlu1 %v1906_v54, 264  ;;  %v2212_v54 = vmul.f32 0.6931472, %v3315_v24 }
 0x1a0   :  { %v2140_v50 = vpop.xlane.xlu1 %2139  ;;  %v2268_v51 = vadd.f32 %v2214_v44, %v4535_v18 }
 0x1a1   :  { %v2137_v35 = vpop.xlane.xlu0 %2136  ;;  %v2267_v10 = vadd.f32 %v2212_v54, %v4532_v33 }
 0x1a2   :  { %3322 = vlog2.f32 %v2137_v35 }
 0x1a3   :  { %3324 = vlog2.f32 %v2140_v50 }
 0x1a4   :  { %v4239_v26 = vpop.xlane.xlu1 %2187  ;;  %v3319_v5 = vpop.eup %3318 }
 0x1a5   :  { %v4237_v58 = vpop.xlane.xlu0 %2184  ;;  %v3321_v16 = vpop.eup %3320 }
 0x1a8   :  { %v2146_v29 = vpop.xlane.xlu1 %2145 }
 0x1a9   :  { %v2143_v4 = vpop.xlane.xlu0 %2142 }
 0x1aa   :  { %3326 = vlog2.f32 %v2143_v4  ;;  %v2216_v4 = vmul.f32 0.6931472, %v3319_v5 }
 0x1ab   :  { %3328 = vlog2.f32 %v4206_v17 }
 0x1ac   :  { %v4245_v52 = vpop.xlane.xlu1 %2193  ;;  %3330 = vlog2.f32 %v2146_v29  ;;  %v3323_v14 = vpop.eup %3322  ;;  %v2218_v29 = vmul.f32 0.6931472, %v3321_v16 }
 0x1ad   :  { %v4243_v63 = vpop.xlane.xlu0 %2190  ;;  %3332 = vlog2.f32 %v4208_v30  ;;  %v3325_v42 = vpop.eup %3324 }
 0x1ae   :  { %3334 = vlog2.f32 %v4211_v0  ;;  %v2222_v0 = vmul.f32 0.6931472, %v3325_v42  ;;  %v2270_v48 = vadd.f32 %v2218_v29, %v4537_v36 }
 0x1af   :  { %3336 = vlog2.f32 %v4213_v57 }
 0x1b0   :  { %3338 = vlog2.f32 %v4218_v3 }
 0x1b1   :  { %3340 = vlog2.f32 %v4220_v41 }
 0x1b2   :  { %3342 = vlog2.f32 %v4223_v55 }
 0x1b3   :  { %3344 = vlog2.f32 %v4225_v13 }
 0x1b4   :  { %3346 = vlog2.f32 %v4227_v31 }
 0x1b5   :  { %3348 = vlog2.f32 %v4229_v1 }
 0x1b6   :  { %3350 = vlog2.f32 %v4231_v53 }
 0x1b7   :  { %3352 = vlog2.f32 %v4233_v34 }
 0x1b8   :  { %3354 = vlog2.f32 %v4237_v58 }
 0x1b9   :  { %3356 = vlog2.f32 %v4239_v26 }
 0x1d1   :  { %v2313_v12 = vpop.permute.xlu1 %2312  ;;  %v2309_v38 = vpop.permute.xlu0 %2308 }
 0x1d2   :  { %v2452_v8 = vsub.f32 %v2260_v11, %v2313_v12  ;;  %v2451_v62 = vsub.f32 %v2259_v56, %v2309_v38  ;;  %v4533_v11 = vld [vmem:[#allocation22_spill] sm:$0xff] }
 0x1d3   :  { %v2266_v56 = vadd.f32 %v2210_v60, %v4533_v11  ;;  %v2272_v60 = vadd.f32 %v2222_v0, %v4539_v20 }
 0x1d4   :  { %2519 = vperm.xlu1 %3137, %v2452_v8   ;;  %2516 = vperm.xlu0 %3136, %v2451_v62   ;;  %v2220_v8 = vmul.f32 0.6931472, %v3323_v14  ;;  %v4534_v62 = vld [vmem:[#allocation29_spill] sm:$0xff] }
 0x1d5   :  { %v2316_v40 = vpop.permute.xlu1 %2315  ;;  %v2323_v21 = vpop.permute.xlu0 %2322  ;;  %v2269_v2 = vadd.f32 %v2216_v4, %v4534_v62 }
 0x1d6   :  { %v2453_v25 = vsub.f32 %v2261_v19, %v2316_v40  ;;  %v2455_v22 = vsub.f32 %v2263_v43, %v2323_v21  ;;  %v3327_v19 = vpop.eup %3326  ;;  %v2271_v61 = vadd.f32 %v2220_v8, %v4536_v9  ;;  %3358 = vlog2.f32 %v4243_v63  ;;  %v4548_v63 = vld [vmem:[#allocation27_spill] sm:$0xff] }
 0x1d7   :  { %v2224_v21 = vmul.f32 0.6931472, %v3327_v19 }
 0x1d8   :  { %2522 = vperm.xlu1 %3137, %v2453_v25   ;;  %v3329_v25 = vpop.eup %3328  ;;  %3360 = vlog2.f32 %v4245_v52  ;;  %v4551_v52 = vld [vmem:[#allocation28_spill] sm:$0xff] }
 0x1d9   :  { %v2320_v37 = vpop.permute.xlu1 %2319  ;;  %v2330_v32 = vpop.permute.xlu0 %2329  ;;  %v2228_v3 = vmul.f32 0.6931472, %v3329_v25 }
 0x1da   :  { %v2454_v23 = vsub.f32 %v2262_v39, %v2320_v37  ;;  %v2457_v35 = vsub.f32 %v2265_v27, %v2330_v32  ;;  %v3331_v43 = vpop.eup %3330 }
 0x1db   :  { %v3333_v37 = vpop.eup %3332 }
 0x1dc   :  { %2528 = vperm.xlu1 %3137, %v2455_v22   ;;  %2525 = vperm.xlu0 %3136, %v2454_v23   ;;  %v2226_v22 = vmul.f32 0.6931472, %v3331_v43  ;;  %v4538_v23 = vld [vmem:[#allocation37_spill] sm:$0xff]  ;;  %v3335_v54 = vpop.eup %3334  ;;  %v2230_v55 = vmul.f32 0.6931472, %v3333_v37 }
 0x1dd   :  { %v2327_v7 = vpop.permute.xlu1 %2326  ;;  %v2273_v32 = vadd.f32 %v2224_v21, %v4538_v23  ;;  %v2232_v5 = vmul.f32 0.6931472, %v3335_v54  ;;  %v4546_v21 = vld [vmem:[#allocation23_spill] sm:$0xff] }
 0x1de   :  { %v2456_v49 = vsub.f32 %v2264_v28, %v2327_v7  ;;  %v2337_v50 = vpop.permute.xlu0 %2336  ;;  %v3337_v28 = vpop.eup %3336  ;;  %v4540_v7 = vld [vmem:[#allocation13_spill] sm:$0xff] }
 0x1df   :  { %v2459_v12 = vsub.f32 %v2267_v10, %v2337_v50  ;;  %v3339_v16 = vpop.eup %3338  ;;  %v2234_v31 = vmul.f32 0.6931472, %v3337_v28  ;;  %v4550_v28 = vld [vmem:[#allocation31_spill] sm:$0xff] }
 0x1e0   :  { %2534 = vperm.xlu1 %3137, %v2457_v35   ;;  %2531 = vperm.xlu0 %3136, %v2456_v49   ;;  %v2275_v35 = vadd.f32 %v2228_v3, %v4540_v7  ;;  %v4541_v49 = vld [vmem:[#allocation38_spill] sm:$0xff]  ;;  %v3341_v10 = vpop.eup %3340  ;;  %v2236_v11 = vmul.f32 0.6931472, %v3339_v16 }
 0x1e1   :  { %v2334_v45 = vpop.permute.xlu1 %2333  ;;  %v2274_v50 = vadd.f32 %v2226_v22, %v4541_v49  ;;  %v2238_v53 = vmul.f32 0.6931472, %v3341_v10  ;;  %v4549_v22 = vld [vmem:[#allocation24_spill] sm:$0xff] }
 0x1e2   :  { %v2458_v38 = vsub.f32 %v2266_v56, %v2334_v45  ;;  %v2344_v17 = vpop.permute.xlu0 %2343  ;;  %v4542_v56 = vld [vmem:[#allocation15_spill] sm:$0xff]  ;;  %v4543_v45 = vld [vmem:[#allocation14_spill] sm:$0xff]  ;;  %v4553_v10 = vld [vmem:[#allocation32_spill] sm:$0xff] }
 0x1e3   :  { %v2461_v46 = vsub.f32 %v2269_v2, %v2344_v17  ;;  %v2277_v14 = vadd.f32 %v2232_v5, %v4542_v56  ;;  %v4544_v2 = vld [vmem:[#allocation19_spill] sm:$0xff] }
 0x1e4   :  { %2540 = vperm.xlu1 %3137, %v2459_v12   ;;  %2537 = vperm.xlu0 %3136, %v2458_v38   ;;  %v2276_v12 = vadd.f32 %v2230_v55, %v4543_v45  ;;  %v3343_v38 = vpop.eup %3342  ;;  %v2279_v18 = vadd.f32 %v2236_v11, %v4544_v2  ;;  %v4556_v2 = vld [vmem:[#allocation40_spill] sm:$0xff] }
 0x1e5   :  { %v2341_v47 = vpop.permute.xlu1 %2340  ;;  %v3345_v8 = vpop.eup %3344  ;;  %v2240_v62 = vmul.f32 0.6931472, %v3343_v38 }
 0x1e6   :  { %v2460_v30 = vsub.f32 %v2268_v51, %v2341_v47  ;;  %v2351_v40 = vpop.permute.xlu0 %2350  ;;  %v4545_v51 = vld [vmem:[#allocation16_spill] sm:$0xff]  ;;  %v3347_v47 = vpop.eup %3346  ;;  %v2242_v58 = vmul.f32 0.6931472, %v3345_v8 }
 0x1e7   :  { %v2463_v39 = vsub.f32 %v2271_v61, %v2351_v40  ;;  %v2278_v19 = vadd.f32 %v2234_v31, %v4545_v51  ;;  %v3349_v25 = vpop.eup %3348  ;;  %v2244_v0 = vmul.f32 0.6931472, %v3347_v47  ;;  %v2281_v9 = vadd.f32 %v2240_v62, %v4546_v21  ;;  %v4547_v61 = vld [vmem:[#allocation20_spill] sm:$0xff] }
 0x1e8   :  { %2546 = vperm.xlu1 %3137, %v2461_v46   ;;  %2543 = vperm.xlu0 %3136, %v2460_v30   ;;  %v2280_v36 = vadd.f32 %v2238_v53, %v4547_v61  ;;  %v2282_v23 = vadd.f32 %v2242_v58, %v4549_v22 }
 0x1e9   :  { %v2348_v59 = vpop.permute.xlu1 %2347  ;;  %v2283_v3 = vadd.f32 %v2244_v0, %v4548_v63  ;;  %v2882_v63 = vld [vmem:[%s4463_s2 + $0x10] sm:$0xff] }
 0x1ea   :  { %v2462_v57 = vsub.f32 %v2270_v48, %v2348_v59  ;;  %v2358_v24 = vpop.permute.xlu0 %2357  ;;  %v3351_v48 = vpop.eup %3350 }
 0x1eb   :  { %v2465_v27 = vsub.f32 %v2273_v32, %v2358_v24  ;;  %v3353_v26 = vpop.eup %3352  ;;  %v2246_v24 = vmul.f32 0.6931472, %v3349_v25  ;;  %v2248_v37 = vmul.f32 0.6931472, %v3351_v48 }
 0x1ec   :  { %2552 = vperm.xlu1 %3137, %v2463_v39   ;;  %2549 = vperm.xlu0 %3136, %v2462_v57   ;;  %v3355_v32 = vpop.eup %3354 }
 0x1ed   :  { %v2355_v6 = vpop.permute.xlu1 %2354  ;;  %v2285_v55 = vadd.f32 %v2248_v37, %v4550_v28  ;;  %v2284_v5 = vadd.f32 %v2246_v24, %v4551_v52  ;;  %v2883_v52 = vld [vmem:[%s4463_s2 + $0x18] sm:$0xff] }
 0x1ee   :  { %v2464_v41 = vsub.f32 %v2272_v60, %v2355_v6  ;;  %v2365_v15 = vpop.permute.xlu0 %2364 }
 0x1ef   :  { %v2467_v4 = vsub.f32 %v2275_v35, %v2365_v15  ;;  %v2252_v15 = vmul.f32 0.6931472, %v3355_v32  ;;  %v2807_v32 = vmul.f32 1.442695, %v2882_v63 }
 0x1f0   :  { %2558 = vperm.xlu1 %3137, %v2465_v27   ;;  %2555 = vperm.xlu0 %3136, %v2464_v41   ;;  %v3357_v27 = vpop.eup %3356  ;;  %v2250_v41 = vmul.f32 0.6931472, %v3353_v26  ;;  %v53_v26 = vlaneseq }
 0x1f1   :  { %v2362_v44 = vpop.permute.xlu1 %2361  ;;  %v3359_v7 = vpop.eup %3358  ;;  %3362 = vpow2.f32 %v2807_v32 }
 0x1f2   :  { %v2466_v13 = vsub.f32 %v2274_v50, %v2362_v44  ;;  %v2372_v33 = vpop.permute.xlu0 %2371  ;;  %v2254_v44 = vmul.f32 0.6931472, %v3357_v27  ;;  %v2286_v31 = vadd.f32 %v2250_v41, %v4553_v10  ;;  %v3361_v11 = vpop.eup %3360 }
 0x1f3   :  { %v2469_v42 = vsub.f32 %v2277_v14, %v2372_v33  ;;  %v2258_v38 = vmul.f32 0.6931472, %v3361_v11 }
 0x1f4   :  { %2564 = vperm.xlu1 %3137, %v2467_v4   ;;  %2561 = vperm.xlu0 %3136, %v2466_v13   ;;  %v2256_v4 = vmul.f32 0.6931472, %v3359_v7  ;;  %v4552_v13 = vld [vmem:[#allocation35_spill] sm:$0xff] }
 0x1f5   :  { %v2369_v17 = vpop.permute.xlu1 %2368  ;;  %v2287_v33 = vadd.f32 %v2252_v15, %v4552_v13 }
 0x1f6   :  { %v2468_v1 = vsub.f32 %v2276_v12, %v2369_v17  ;;  %v2379_v29 = vpop.permute.xlu0 %2378  ;;  %v4554_v17 = vld [vmem:[#allocation39_spill] sm:$0xff] }
 0x1f7   :  { %v2471_v30 = vsub.f32 %v2279_v18, %v2379_v29  ;;  %v2290_v18 = vadd.f32 %v2258_v38, %v4556_v2  ;;  %v4365_v38 = vadd.f32 1.0, %v2883_v52 }
 0x1f8   :  { %2570 = vperm.xlu1 %3137, %v2469_v42   ;;  %2567 = vperm.xlu0 %3136, %v2468_v1   ;;  %v2289_v42 = vadd.f32 %v2256_v4, %v4554_v17  ;;  %v4555_v1 = vld [vmem:[#allocation36_spill] sm:$0xff] }
 0x1f9   :  { %v2376_v46 = vpop.permute.xlu1 %2375  ;;  %v2288_v29 = vadd.f32 %v2254_v44, %v4555_v1 }
 0x1fa   :  { %v2470_v34 = vsub.f32 %v2278_v19, %v2376_v46  ;;  %v2386_v40 = vpop.permute.xlu0 %2385  ;;  %v51_v19 = vld [vmem:[%s4462_s1] sm:$0xff]  ;;  %v52_v46 = vld [vmem:[%s4462_s1 + $0x8] sm:$0xff] }
 0x1fb   :  { %v2473_v59 = vsub.f32 %v2281_v9, %v2386_v40 }
 0x1fc   :  { %2576 = vperm.xlu1 %3137, %v2471_v30   ;;  %2573 = vperm.xlu0 %3136, %v2470_v34  }
 0x1fd   :  { %v2383_v43 = vpop.permute.xlu1 %2382 }
 0x1fe   :  { %v2472_v39 = vsub.f32 %v2280_v36, %v2383_v43  ;;  %v2393_v57 = vpop.permute.xlu0 %2392 }
 0x1ff   :  { %v2475_v60 = vsub.f32 %v2283_v3, %v2393_v57  ;;  %v4322_v3 = vand.u32 127, %v53_v26 }
 0x200   :  { %2582 = vperm.xlu1 %3137, %v2473_v59   ;;  %2579 = vperm.xlu0 %3136, %v2472_v39  }
 0x201   :  { %v2390_v20 = vpop.permute.xlu1 %2389 }
 0x202   :  { %v2474_v54 = vsub.f32 %v2282_v23, %v2390_v20  ;;  %v2400_v6 = vpop.permute.xlu0 %2399  ;;  %v2612_v20 = vshrl.u32 %v53_v26, 7 }
 0x203   :  { %v2477_v49 = vsub.f32 %v2285_v55, %v2400_v6  ;;  %v2796_v55 = vld [vmem:[%s4463_s2] sm:$0xff] }
 0x204   :  { %2588 = vperm.xlu1 %3137, %v2475_v60   ;;  %2585 = vperm.xlu0 %3136, %v2474_v54   ;;  %v2615_v60 = vadd.s32 4294967288, %v4322_v3  ;;  %v4336_v41 = vsub.s32 %v4322_v3, %v2612_v20 }
 0x205   :  { %v2397_v35 = vpop.permute.xlu1 %2396 }
 0x206   :  { %v2476_v50 = vsub.f32 %v2284_v5, %v2397_v35  ;;  %v2407_v16 = vpop.permute.xlu0 %2406  ;;  %v4333_v27 = vsub.s32 %v2615_v60, %v2612_v20  ;;  %v2797_v35 = vld [vmem:[%s4463_s2 + $0x8] sm:$0xff] }
 0x207   :  { %v2479_v14 = vsub.f32 %v2287_v33, %v2407_v16  ;;  %v2809_v16 = vmul.f32 1.442695, %v2883_v52 }
 0x208   :  { %2594 = vperm.xlu1 %3137, %v2477_v49   ;;  %2591 = vperm.xlu0 %3136, %v2476_v50   ;;  %v2801_v49 = vadd.f32 1.0, %v2882_v63  ;;  %v2803_v50 = vmul.f32 %v2796_v55, %v2796_v55 }
 0x209   :  { %v2404_v56 = vpop.permute.xlu1 %2403  ;;  %3364 = vpow2.f32 %v2809_v16 }
 0x20a   :  { %v2478_v45 = vsub.f32 %v2286_v31, %v2404_v56  ;;  %v2414_v12 = vpop.permute.xlu0 %2413  ;;  %v2805_v17 = vsub.f32 %v2801_v49, %v2803_v50 }
 0x20b   :  { %v2481_v53 = vsub.f32 %v2289_v42, %v2414_v12  ;;  %v3363_v42 = vpop.eup %3362 }
 0x20c   :  { %2597 = vperm.xlu0 %3136, %v2478_v45   ;;  %2600 = vperm.xlu1 %3137, %v2479_v14   ;;  %v4362_v45 = vmul.f32 %v2797_v35, %v2797_v35 }
 0x20d   :  { %v2411_v8 = vpop.permute.xlu1 %2410 }
 0x20e   :  { %v2480_v62 = vsub.f32 %v2288_v29, %v2411_v8 }
 0x210   :  { %2603 = vperm.xlu0 %3136, %v2480_v62   ;;  %2606 = vperm.xlu1 %3137, %v2481_v53  }
 0x211   :  { %v2418_v51 = vpop.permute.xlu1 %2417 }
 0x212   :  { %v2482_v47 = vsub.f32 %v2290_v18, %v2418_v51 }
 0x214   :  { %2609 = vperm.xlu0 %3136, %v2482_v47   ;;  %56 = vperm.xlu1 %3137, %v51_v19  }
 0x218   :  { %59 = vperm.xlu0 %3136, %v52_v46  }
 0x253   :  { %v2520_v30 = vpop.permute.xlu1 %2519  ;;  %v2517_v34 = vpop.permute.xlu0 %2516 }
 0x254   :  { %v2619_v44 = vrot.slane %v2520_v30, %v4333_v27  ;;  %v2614_v4 = vrot.slane %v2517_v34, %v4336_v41  ;;  %v2806_v30 = vsub.f32 %v4365_v38, %v4362_v45  ;;  %v2811_v34 = vsub.f32 %v2805_v17, %v3363_v42  ;;  %v49_v17 = vld [vmem:[%s4461_s0] sm:$0xff] }
 0x256   :  { %v2621_v1 = vsel %vm2620_vm1, %v2619_v44, %v2614_v4 }
 0x257   :  { %v2523_v40 = vpop.permute.xlu1 %2522 }
 0x258   :  { %v2625_v13 = vrot.slane %v2523_v40, %v4336_v41 }
 0x25b   :  { %v2529_v25 = vpop.permute.xlu1 %2528  ;;  %v2526_v58 = vpop.permute.xlu0 %2525 }
 0x25c   :  { %v2629_v5 = vrot.slane %v2526_v58, %v4333_v27  ;;  %v2634_v11 = vrot.slane %v2529_v25, %v4336_v41 }
 0x25e   :  { %v2630_v56 = vsel %vm2620_vm1, %v2629_v5, %v2625_v13 }
 0x25f   :  { %v2535_v0 = vpop.permute.xlu1 %2534  ;;  %v2532_v21 = vpop.permute.xlu0 %2531  ;;  %v2758_v2 = vsel %vm2757_vm2, %v2630_v56, %v2621_v1 }
 0x260   :  { %v2638_v7 = vrot.slane %v2532_v21, %v4333_v27  ;;  %v2643_v14 = vrot.slane %v2535_v0, %v4336_v41 }
 0x262   :  { %v2639_v12 = vsel %vm2620_vm1, %v2638_v7, %v2634_v11 }
 0x263   :  { %v4301_v9 = vpop.permute.xlu1 %2540  ;;  %v2538_v61 = vpop.permute.xlu0 %2537  ;;  %v2760_v18 = vsel %vm2759_vm3, %v2639_v12, %v2758_v2  ;;  %v2814_v2 = vsel %vm2813_vm9, %v2811_v34, 0.0 }
 0x264   :  { %v2647_v33 = vrot.slane %v2538_v61, %v4333_v27  ;;  %v2652_v51 = vrot.slane %v4301_v9, %v4336_v41 }
 0x266   :  { %v2648_v29 = vsel %vm2620_vm1, %v2647_v33, %v2643_v14 }
 0x267   :  { %v4303_v36 = vpop.permute.xlu1 %2546  ;;  %v4305_v48 = vpop.permute.xlu0 %2543  ;;  %v2762_v47 = vsel %vm2761_vm4, %v2648_v29, %v2760_v18 }
 0x268   :  { %v2656_v8 = vrot.slane %v4305_v48, %v4333_v27  ;;  %v2661_v40 = vrot.slane %v4303_v36, %v4336_v41 }
 0x26a   :  { %v2657_v25 = vsel %vm2620_vm1, %v2656_v8, %v2652_v51 }
 0x26b   :  { %v4307_v43 = vpop.permute.xlu1 %2552  ;;  %v4309_v59 = vpop.permute.xlu0 %2549 }
 0x26c   :  { %v2665_v19 = vrot.slane %v4309_v59, %v4333_v27  ;;  %v2670_v61 = vrot.slane %v4307_v43, %v4336_v41 }
 0x26e   :  { %v2666_v26 = vsel %vm2620_vm1, %v2665_v19, %v2661_v40 }
 0x26f   :  { %v4311_v39 = vpop.permute.xlu1 %2558  ;;  %v4313_v57 = vpop.permute.xlu0 %2555 }
 0x270   :  { %v2674_v58 = vrot.slane %v4313_v57, %v4333_v27  ;;  %v2679_v60 = vrot.slane %v4311_v39, %v4336_v41  ;;  %v2764_v39 = vsel %vm2763_vm5, %v2657_v25, %v2762_v47 }
 0x271   :  { %v2766_v16 = vsel %vm2765_vm6, %v2666_v26, %v2764_v39 }
 0x273   :  { %v4315_v24 = vpop.permute.xlu1 %2564  ;;  %v4317_v37 = vpop.permute.xlu0 %2561 }
 0x274   :  { %v2688_v57 = vrot.slane %v4315_v24, %v4336_v41  ;;  %v2683_v43 = vrot.slane %v4317_v37, %v4333_v27  ;;  %v2675_v24 = vsel %vm2620_vm1, %v2674_v58, %v2670_v61  ;;  %v3365_v37 = vpop.eup %3364 }
 0x275   :  { %v2768_v33 = vsel %vm2767_vm7, %v2675_v24, %v2766_v16  ;;  %v2812_v14 = vsub.f32 %v2806_v30, %v3365_v37 }
 0x276   :  { %v2684_v44 = vsel %vm2620_vm1, %v2683_v43, %v2679_v60 }
 0x277   :  { %v4324_v22 = vpop.permute.xlu1 %2570  ;;  %v4326_v23 = vpop.permute.xlu0 %2567  ;;  %v2770_v1 = vsel %vm2769_vm8, %v2684_v44, %v2768_v33  ;;  %v2815_v19 = vsel %vm2813_vm9, %v2812_v14, 0.0 }
 0x278   :  { %v2697_v48 = vrot.slane %v4324_v22, %v4336_v41  ;;  %v2692_v59 = vrot.slane %v4326_v23, %v4333_v27  ;;  %v2780_v18 = vsel %vm146_vm0, %v2770_v1, 0.0  ;;  %v2816_v58 = vadd.f32 %v2815_v19, %v2814_v2 }
 0x27a   :  { %v2693_v52 = vsel %vm2620_vm1, %v2692_v59, %v2688_v57 }
 0x27b   :  { %v4329_v54 = vpop.permute.xlu1 %2576  ;;  %v4331_v6 = vpop.permute.xlu0 %2573 }
 0x27c   :  { %v2701_v46 = vrot.slane %v4331_v6, %v4333_v27  ;;  %v2706_v63 = vrot.slane %v4329_v54, %v4336_v41 }
 0x27e   :  { %v2702_v22 = vsel %vm2620_vm1, %v2701_v46, %v2697_v48 }
 0x27f   :  { %v4338_v15 = vpop.permute.xlu1 %2582  ;;  %v4340_v28 = vpop.permute.xlu0 %2579  ;;  %v2771_v35 = vsel %vm2757_vm2, %v2702_v22, %v2693_v52 }
 0x280   :  { %v2710_v0 = vrot.slane %v4340_v28, %v4333_v27  ;;  %v2715_v23 = vrot.slane %v4338_v15, %v4336_v41 }
 0x282   :  { %v2711_v6 = vsel %vm2620_vm1, %v2710_v0, %v2706_v63 }
 0x283   :  { %v4357_v10 = vpop.permute.xlu1 %2588  ;;  %v2586_v31 = vpop.permute.xlu0 %2585  ;;  %v2772_v4 = vsel %vm2759_vm3, %v2711_v6, %v2771_v35 }
 0x284   :  { %v2719_v36 = vrot.slane %v2586_v31, %v4333_v27  ;;  %v2724_v54 = vrot.slane %v4357_v10, %v4336_v41 }
 0x286   :  { %v2720_v5 = vsel %vm2620_vm1, %v2719_v36, %v2715_v23 }
 0x287   :  { %v2595_v53 = vpop.permute.xlu1 %2594  ;;  %v2592_v62 = vpop.permute.xlu0 %2591  ;;  %v2773_v10 = vsel %vm2761_vm4, %v2720_v5, %v2772_v4 }
 0x288   :  { %v2728_v32 = vrot.slane %v2592_v62, %v4333_v27  ;;  %v2733_v15 = vrot.slane %v2595_v53, %v4336_v41 }
 0x28a   :  { %v2729_v49 = vsel %vm2620_vm1, %v2728_v32, %v2724_v54 }
 0x28b   :  { %v2601_v21 = vpop.permute.xlu1 %2600  ;;  %v2598_v9 = vpop.permute.xlu0 %2597  ;;  %v2774_v45 = vsel %vm2763_vm5, %v2729_v49, %v2773_v10 }
 0x28c   :  { %v2737_v20 = vrot.slane %v2598_v9, %v4333_v27  ;;  %v2742_v50 = vrot.slane %v2601_v21, %v4336_v41 }
 0x28e   :  { %v2738_v13 = vsel %vm2620_vm1, %v2737_v20, %v2733_v15 }
 0x28f   :  { %v2607_v28 = vpop.permute.xlu1 %2606  ;;  %v2604_v55 = vpop.permute.xlu0 %2603  ;;  %v2775_v42 = vsel %vm2765_vm6, %v2738_v13, %v2774_v45 }
 0x290   :  { %v2746_v7 = vrot.slane %v2604_v55, %v4333_v27  ;;  %v2751_v12 = vrot.slane %v2607_v28, %v4336_v41  ;;  %v50_v41 = vld [vmem:[%s4461_s0 + $0x8] sm:$0xff] }
 0x292   :  { %v2747_v31 = vsel %vm2620_vm1, %v2746_v7, %v2742_v50 }
 0x293   :  { %v2610_v11 = vpop.permute.xlu0 %2609  ;;  %v57_v56 = vpop.permute.xlu1 %56  ;;  %v2776_v29 = vsel %vm2767_vm7, %v2747_v31, %v2775_v42 }
 0x294   :  { %v2755_v38 = vrot.slane %v2610_v11, %v4333_v27  ;;  %vm61_vm10 = vcmp.eq.s32.totalorder %v4322_v3, %v57_v56 }
 0x295   :  { %v63_v27 = vsel %vm61_vm10, %v49_v17, 0.0 }
 0x296   :  { %v2756_v8 = vsel %vm2620_vm1, %v2755_v38, %v2751_v12  ;;  %v66_v30 = vsel %vm65_vm11, %v63_v27, 0.0 }
 0x297   :  { %v60_v53 = vpop.permute.xlu0 %59  ;;  %v2777_v62 = vsel %vm2769_vm8, %v2756_v8, %v2776_v29 }
 0x298   :  { %vm62_vm12 = vcmp.eq.s32.totalorder %v4322_v3, %v60_v53  ;;  %v2781_v51 = vsel %vm146_vm0, %v2777_v62, 0.0 }
 0x299   :  { %v64_v47 = vsel %vm62_vm12, %v50_v41, 0.0  ;;  %v2782_v46 = vadd.f32 %v2781_v51, %v2780_v18 }
 0x29a   :  { %v67_v40 = vsel %vm65_vm11, %v64_v47, 0.0 }
 0x29b   :  { %v68_v25 = vadd.f32 %v67_v40, %v66_v30  ;;  %2783 = vadd.xlane.f32.xlu0 %v2782_v46 }
 0x29d   :  { %69 = vadd.xlane.f32.xlu1 %v68_v25 }
 0x29f   :  { %2817 = vadd.xlane.f32.xlu0 %v2816_v58 }
 0x328   :  { %v2784_v0 = vpop.xlane.xlu0 %2783 }
 0x329   :  { %v2785_v21 = vrot.slane %v2784_v0, 4 }
 0x32a   :  { %v70_v34 = vpop.xlane.xlu1 %69 }
 0x32b   :  { %v2786_v9 = vadd.f32 %v2785_v21, %v2784_v0  ;;  %v71_v3 = vrot.slane %v70_v34, 4 }
 0x32c   :  { %v2818_v61 = vpop.xlane.xlu0 %2817 }
 0x32d   :  { %v2787_v48 = vrot.slane %v2786_v9, 2  ;;  %v72_v59 = vadd.f32 %v71_v3, %v70_v34  ;;  %v2819_v36 = vrot.slane %v2818_v61, 4 }
 0x32f   :  { %v73_v26 = vrot.slane %v72_v59, 2  ;;  %v2820_v57 = vadd.f32 %v2819_v36, %v2818_v61  ;;  %v2788_v63 = vadd.f32 %v2787_v48, %v2786_v9 }
 0x331   :  { %v2821_v32 = vrot.slane %v2820_v57, 2  ;;  %v74_v43 = vadd.f32 %v73_v26, %v72_v59  ;;  %v2789_v22 = vrot.slane %v2788_v63, 1 }
 0x333   :  { %v2822_v23 = vadd.f32 %v2821_v32, %v2820_v57  ;;  %v75_v20 = vrot.slane %v74_v43, 1  ;;  %v2790_v6 = vadd.f32 %v2789_v22, %v2788_v63 }
 0x335   :  { %v76_v60 = vadd.f32 %v75_v20, %v74_v43  ;;  %v2823_v24 = vrot.slane %v2822_v23, 1 }
 0x337   :  { %3124 = vpush %v76_v60  ;;  %v2824_v54 = vadd.f32 %v2823_v24, %v2822_v23 }
 0x338   :  { %3126 = vpush %v2790_v6 }
 0x339   :  { %3128 = vpush %v2824_v54 }
 0x368   :  { %s3125_s0 = spop %3124 }
 0x369   :  { %s78_s6 = ssub.f32 0.0, %s3125_s0  ;;  %s3127_s7 = spop %3126 }
 0x36a   :  { %s2794_s8 = smul.f32 0.00390625, %s3127_s7  ;;  %s3129_s9 = spop %3128 }
 0x36b   :  { %s81_s10 = smul.f32 0.0625, %s78_s6 }
 0x36c   :  { %s2795_s11 = smul.f32 0.1, %s2794_s8 }
 0x36d   :  { %s2826_s12 = smul.f32 -0.5, %s3129_s9 }
 0x36e   :  { %s2831_s14 = sadd.f32 %s2795_s11, %s81_s10 }
 0x36f   :  { %s2827_s13 = smul.f32 0.1, %s2826_s12 }
 0x371   :  { %s2830_s15 = smul.f32 0.001953125, %s2827_s13 }
 0x373   :  { %s2832_s16 = sadd.f32 %s2831_s14, %s2830_s15 }
 0x375   :  { %2834 = sst [smem:[#allocation7]] %s2832_s16 }
 0x376   :  { %3419 = shalt.err (!%p3416_p4)
}
 0x377   :  { %s3431_s21 = smov [#allocation7]  }
 0x378   :  { %2842 = dma.smem_to_hbm %s3431_s21, 16, %s4466_s5, [#allocation4]  }
 0x379   :  { %3424 = dma.done.wait [#allocation4], 16  }
 0x37a   :  { %3425 = vsyncadd [#allocation4], 4294967280 }
 0x37b   :  { %2846 = sfence }
 0x37c   :  { %2847 = vsyncpa [#allocation3], 1 }
 0x37d   :  { %2848 = vsyncpa [#allocation6], 1 }
 0x37e   :  { %2849 = vsyncpa [#allocation4], 1 }

</bundles_post_ra>
